<compile_context>
chip_gen: v5e
topology: v5e:2x2
jax: 0.10.0
libtpu: 0.0.40
codegen_flags: <defaults>
</compile_context>

<pallas_src>
import math
import jax
import jax.numpy as jnp
from jax.experimental import pallas as pl
from jax.experimental.pallas import tpu as pltpu

# ----------------------------- config (SLMConfig) -----------------------------
BATCH = 2
SEQ = 8                      # power of two -> batch-id via right-shift in kernel
HIDDEN = 64
N_HEADS = 4
HEAD_DIM = 16                # hidden_size // num_heads
N_KV_HEADS = 2
KV_GROUPS = N_HEADS // N_KV_HEADS
INTER = 128                  # intermediate_size
EPS = 1e-6
ROPE_BASE = 10000.0
NEG_INF = -1e9

ST = BATCH * SEQ             # flattened token count
assert SEQ & (SEQ - 1) == 0, "SEQ must be a power of two for the in-kernel mask"
SEQ_SHIFT = SEQ.bit_length() - 1


# ----------------------------- Pallas kernel -----------------------------
def decoder_layer_kernel(x_ref, cos_ref, sin_ref,
                         ln1_ref, wq_ref, wqr_ref, wk_ref, wkr_ref, wv_ref, wo_ref,
                         ln2_ref, wg_ref, wu_ref, wd_ref,
                         out_ref):
    x = x_ref[...]                       # (ST, H) f32
    cos = cos_ref[...]                   # (ST, hd) f32
    sin = sin_ref[...]                   # (ST, hd) f32

    def rmsnorm(h, w):                   # f32 elementwise path (v5e-friendly)
        var = jnp.mean(h * h, axis=-1, keepdims=True)
        return w * (h * jax.lax.rsqrt(var + EPS))

    def bmm(a, b, dn):                   # bf16 operands, f32 accumulation on MXU
        return jax.lax.dot_general(a, b, dimension_numbers=dn,
                                   preferred_element_type=jnp.float32)

    # ---------------- input layernorm ----------------
    normed = rmsnorm(x, ln1_ref[...])                                   # (ST, H) f32
    normed_b = jnp.broadcast_to(normed.astype(jnp.bfloat16),
                                (N_HEADS, ST, HIDDEN))                  # (nH, ST, H)

    # (nH, ST, H) x (nH, H, hd) -> (nH, ST, hd), batched over heads
    proj_dn = (((2,), (1,)), ((0,), (0,)))
    q = bmm(normed_b, wq_ref[...], proj_dn)
    q_rot = bmm(normed_b, wqr_ref[...], proj_dn)    # rotate_half folded into weights
    k = bmm(normed_b, wk_ref[...], proj_dn)         # kv heads pre-repeated (GQA)
    k_rot = bmm(normed_b, wkr_ref[...], proj_dn)
    v = bmm(normed_b, wv_ref[...], proj_dn)

    # ---------------- RoPE: two full-width FMAs ----------------
    q = q * cos + q_rot * sin                                           # (nH, ST, hd)
    k = k * cos + k_rot * sin

    # ---------------- block-diagonal causal mask (in-kernel) ----------------
    q_pos = jax.lax.broadcasted_iota(jnp.int32, (ST, ST), 0)
    k_pos = jax.lax.broadcasted_iota(jnp.int32, (ST, ST), 1)
    same_batch = jnp.right_shift(q_pos, SEQ_SHIFT) == jnp.right_shift(k_pos, SEQ_SHIFT)
    keep = same_batch & (k_pos <= q_pos)
    mask = jnp.where(keep, 0.0, NEG_INF).astype(jnp.float32)            # (ST, ST)

    # ---------------- head-batched attention ----------------
    scale = 1.0 / math.sqrt(HEAD_DIM)
    scores = bmm(q.astype(jnp.bfloat16), k.astype(jnp.bfloat16),
                 (((2,), (2,)), ((0,), (0,)))) * scale + mask           # (nH, ST, ST)
    scores = scores - jnp.max(scores, axis=-1, keepdims=True)
    p = jnp.exp(scores)
    p = p * pl.reciprocal(jnp.sum(p, axis=-1, keepdims=True), approx=True)
    # attention_dropout is a no-op in eval mode

    ctx = bmm(p.astype(jnp.bfloat16), v.astype(jnp.bfloat16),
              (((2,), (1,)), ((0,), (0,))))                             # (nH, ST, hd)

    # output projection per head, summed over heads (no lane concatenate)
    attn_heads = bmm(ctx.astype(jnp.bfloat16), wo_ref[...],
                     (((2,), (1,)), ((0,), (0,))))                      # (nH, ST, H)
    attn = attn_heads[0]
    for h in range(1, N_HEADS):
        attn = attn + attn_heads[h]                                     # (ST, H) f32

    h1 = x + attn  # first residual

    # ---------------- post-attention layernorm + SwiGLU MLP ----------------
    normed2 = rmsnorm(h1, ln2_ref[...])
    n2_bf = normed2.astype(jnp.bfloat16)
    gate = jnp.dot(n2_bf, wg_ref[...], preferred_element_type=jnp.float32)   # (ST, I)
    up = jnp.dot(n2_bf, wu_ref[...], preferred_element_type=jnp.float32)     # (ST, I)
    act = gate * jax.nn.sigmoid(gate)                                        # SiLU, f32
    mlp = jnp.dot((act * up).astype(jnp.bfloat16), wd_ref[...],
                  preferred_element_type=jnp.float32)                        # (ST, H)

    out_ref[...] = (h1 + mlp).astype(out_ref.dtype)


# ----------------------------- wrapper (weight plumbing + pallas_call) -----------------------------
def _per_head(w, n_heads):
    # (H, n_heads*hd) -> (n_heads, H, hd)
    return w.reshape(HIDDEN, n_heads, HEAD_DIM).transpose(1, 0, 2)


def _rot_fold(w_h):
    # per head: x @ w_rot == rotate_half(x @ w)  (rotate_half = [-x2, x1])
    return jnp.concatenate([-w_h[..., HEAD_DIM // 2:], w_h[..., :HEAD_DIM // 2]], axis=-1)


def prepare_weights(params):
    wq_h = _per_head(params["wq"], N_HEADS)                                    # (nH, H, hd)
    wk_h = jnp.repeat(_per_head(params["wk"], N_KV_HEADS), KV_GROUPS, axis=0)  # GQA repeat
    wv_h = jnp.repeat(_per_head(params["wv"], N_KV_HEADS), KV_GROUPS, axis=0)
    wqr_h = _rot_fold(wq_h)
    wkr_h = _rot_fold(wk_h)
    wo_h = params["wo"].reshape(N_HEADS, HEAD_DIM, HIDDEN)                     # (nH, hd, H)
    bf = lambda w: w.astype(jnp.bfloat16)
    return dict(ln1=params["ln1"], ln2=params["ln2"],
                wq=bf(wq_h), wqr=bf(wqr_h), wk=bf(wk_h), wkr=bf(wkr_h), wv=bf(wv_h),
                wo=bf(wo_h), wg=bf(params["wg"]), wu=bf(params["wu"]), wd=bf(params["wd"]))


def slm_decoder_layer(x, cos, sin, params):
    B, S, H = x.shape
    w = prepare_weights(params)
    cos_t = jnp.tile(cos, (B, 1))        # (B*S, hd): positions 0..S-1 per batch element
    sin_t = jnp.tile(sin, (B, 1))
    vmem = pl.BlockSpec(memory_space=pltpu.MemorySpace.VMEM)
    out_flat = pl.pallas_call(
        decoder_layer_kernel,
        out_shape=jax.ShapeDtypeStruct((B * S, H), x.dtype),
        in_specs=[vmem] * 14,
        out_specs=vmem,
    )(x.reshape(B * S, H), cos_t, sin_t,
      w["ln1"], w["wq"], w["wqr"], w["wk"], w["wkr"], w["wv"], w["wo"],
      w["ln2"], w["wg"], w["wu"], w["wd"])
    return out_flat.reshape(B, S, H)


# ----------------------------- glue: rope tables, params, reference -----------------------------
def rope_tables(seq_len, head_dim, base):
    inv_freq = 1.0 / (base ** (jnp.arange(0, head_dim, 2, dtype=jnp.float32) / head_dim))
    t = jnp.arange(seq_len, dtype=jnp.float32)
    freqs = jnp.outer(t, inv_freq)                       # (S, hd/2)
    emb = jnp.concatenate([freqs, freqs], axis=-1)       # (S, hd)
    return jnp.cos(emb), jnp.sin(emb)


def init_params(key):
    ks = jax.random.split(key, 7)
    std = 0.05
    return {
        "ln1": jnp.ones((1, HIDDEN), jnp.float32),
        "ln2": jnp.ones((1, HIDDEN), jnp.float32),
        "wq": std * jax.random.normal(ks[0], (HIDDEN, N_HEADS * HEAD_DIM), jnp.float32),
        "wk": std * jax.random.normal(ks[1], (HIDDEN, N_KV_HEADS * HEAD_DIM), jnp.float32),
        "wv": std * jax.random.normal(ks[2], (HIDDEN, N_KV_HEADS * HEAD_DIM), jnp.float32),
        "wo": std * jax.random.normal(ks[3], (N_HEADS * HEAD_DIM, HIDDEN), jnp.float32),
        "wg": std * jax.random.normal(ks[4], (HIDDEN, INTER), jnp.float32),
        "wu": std * jax.random.normal(ks[5], (HIDDEN, INTER), jnp.float32),
        "wd": std * jax.random.normal(ks[6], (INTER, HIDDEN), jnp.float32),
    }


def reference(x, mask, cos, sin, p):
    def rmsnorm(h, w):
        var = jnp.mean(h * h, axis=-1, keepdims=True)
        return w[0] * (h * jax.lax.rsqrt(var + EPS))

    def rotate_half(t):
        t1, t2 = t[..., : HEAD_DIM // 2], t[..., HEAD_DIM // 2:]
        return jnp.concatenate([-t2, t1], axis=-1)

    normed = rmsnorm(x, p["ln1"])
    q = (normed @ p["wq"]).reshape(BATCH, SEQ, N_HEADS, HEAD_DIM).transpose(0, 2, 1, 3)
    k = (normed @ p["wk"]).reshape(BATCH, SEQ, N_KV_HEADS, HEAD_DIM).transpose(0, 2, 1, 3)
    v = (normed @ p["wv"]).reshape(BATCH, SEQ, N_KV_HEADS, HEAD_DIM).transpose(0, 2, 1, 3)
    q = q * cos + rotate_half(q) * sin
    k = k * cos + rotate_half(k) * sin
    k = jnp.repeat(k, KV_GROUPS, axis=1)
    v = jnp.repeat(v, KV_GROUPS, axis=1)
    s = jnp.einsum("bhqd,bhkd->bhqk", q, k) / math.sqrt(HEAD_DIM) + mask
    w = jax.nn.softmax(s, axis=-1)
    attn = jnp.einsum("bhqk,bhkd->bhqd", w, v).transpose(0, 2, 1, 3).reshape(BATCH, SEQ, HIDDEN)
    h1 = x + attn @ p["wo"]
    n2 = rmsnorm(h1, p["ln2"])
    g = n2 @ p["wg"]
    return h1 + (g * jax.nn.sigmoid(g) * (n2 @ p["wu"])) @ p["wd"]


if __name__ == "__main__":
    key = jax.random.PRNGKey(0)
    kx, kp = jax.random.split(key)
    x = jax.random.normal(kx, (BATCH, SEQ, HIDDEN), jnp.float32)
    params = init_params(kp)
    cos, sin = rope_tables(SEQ, HEAD_DIM, ROPE_BASE)

    out = slm_decoder_layer(x, cos, sin, params)
    out = jax.block_until_ready(out)

    # f32 "gold" reference (per-batch causal mask, full-precision matmuls)
    row = jnp.arange(SEQ)[:, None]
    col = jnp.arange(SEQ)[None, :]
    causal_mask = jnp.where(col <= row, 0.0, NEG_INF).astype(jnp.float32)  # (S, S)
    with jax.default_matmul_precision("highest"):
        ref = reference(x, causal_mask, cos, sin, params)
    ref = jax.block_until_ready(ref)

    assert out.shape == (BATCH, SEQ, HIDDEN)
    assert bool(jnp.all(jnp.isfinite(out)))
    max_err = float(jnp.max(jnp.abs(out - ref)))
    # bf16 matmul operands with f32 accumulation -> ~1e-3 abs error at these scales
    assert bool(jnp.allclose(out, ref, rtol=1e-2, atol=1e-2)), f"max abs diff {max_err}"
    print("KERNEL_OK")
</pallas_src>

<mosaic_0001>
module attributes {stable_mosaic.version = 11 : i64} {
  func.func @decoder_layer_kernel(%arg0: memref<16x64xf32, #tpu.memory_space<vmem>>, %arg1: memref<16x16xf32, #tpu.memory_space<vmem>>, %arg2: memref<16x16xf32, #tpu.memory_space<vmem>>, %arg3: memref<1x64xf32, #tpu.memory_space<vmem>>, %arg4: memref<4x64x16xbf16, #tpu.memory_space<vmem>>, %arg5: memref<4x64x16xbf16, #tpu.memory_space<vmem>>, %arg6: memref<4x64x16xbf16, #tpu.memory_space<vmem>>, %arg7: memref<4x64x16xbf16, #tpu.memory_space<vmem>>, %arg8: memref<4x64x16xbf16, #tpu.memory_space<vmem>>, %arg9: memref<4x16x64xbf16, #tpu.memory_space<vmem>>, %arg10: memref<1x64xf32, #tpu.memory_space<vmem>>, %arg11: memref<64x128xbf16, #tpu.memory_space<vmem>>, %arg12: memref<64x128xbf16, #tpu.memory_space<vmem>>, %arg13: memref<128x64xbf16, #tpu.memory_space<vmem>>, %arg14: memref<16x64xf32, #tpu.memory_space<vmem>>) attributes {dimension_semantics = [], scalar_prefetch = 0 : i64, scratch_operands = 0 : i64, tpu.core_type = #tpu.core_type<tc>} {
    %c0 = arith.constant 0 : index
    %c0_0 = arith.constant 0 : index
    %0 = vector.load %arg0[%c0, %c0_0] : memref<16x64xf32, #tpu.memory_space<vmem>>, vector<16x64xf32>
    %c0_1 = arith.constant 0 : index
    %c0_2 = arith.constant 0 : index
    %1 = vector.load %arg1[%c0_1, %c0_2] : memref<16x16xf32, #tpu.memory_space<vmem>>, vector<16x16xf32>
    %c0_3 = arith.constant 0 : index
    %c0_4 = arith.constant 0 : index
    %2 = vector.load %arg2[%c0_3, %c0_4] : memref<16x16xf32, #tpu.memory_space<vmem>>, vector<16x16xf32>
    %c0_5 = arith.constant 0 : index
    %c0_6 = arith.constant 0 : index
    %3 = vector.load %arg3[%c0_5, %c0_6] : memref<1x64xf32, #tpu.memory_space<vmem>>, vector<1x64xf32>
    %4 = arith.mulf %0, %0 : vector<16x64xf32>
    %cst = arith.constant dense<0.000000e+00> : vector<16xf32>
    %5 = vector.multi_reduction <add>, %4, %cst [1] : vector<16x64xf32> to vector<16xf32>
    %6 = vector.shape_cast %5 : vector<16xf32> to vector<16x1xf32>
    %cst_7 = arith.constant 6.400000e+01 : f32
    %7 = vector.broadcast %cst_7 : f32 to vector<16x1xf32>
    %8 = arith.divf %6, %7 : vector<16x1xf32>
    %cst_8 = arith.constant 9.99999997E-7 : f32
    %9 = vector.broadcast %cst_8 : f32 to vector<16x1xf32>
    %10 = arith.addf %8, %9 : vector<16x1xf32>
    %11 = math.rsqrt %10 : vector<16x1xf32>
    %12 = vector.broadcast %11 : vector<16x1xf32> to vector<16x64xf32>
    %13 = arith.mulf %0, %12 : vector<16x64xf32>
    %14 = vector.broadcast %3 : vector<1x64xf32> to vector<16x64xf32>
    %15 = arith.mulf %14, %13 : vector<16x64xf32>
    %16 = arith.truncf %15 : vector<16x64xf32> to vector<16x64xbf16>
    %17 = vector.shape_cast %16 : vector<16x64xbf16> to vector<1x16x64xbf16>
    %18 = vector.broadcast %17 : vector<1x16x64xbf16> to vector<4x16x64xbf16>
    %c0_9 = arith.constant 0 : index
    %c0_10 = arith.constant 0 : index
    %c0_11 = arith.constant 0 : index
    %19 = vector.load %arg4[%c0_9, %c0_10, %c0_11] : memref<4x64x16xbf16, #tpu.memory_space<vmem>>, vector<4x64x16xbf16>
    %cst_12 = arith.constant dense<0.000000e+00> : vector<4x16x16xf32>
    %20 = tpu.matmul %18, %19, %cst_12 {dimension_numbers = #tpu.dot_dimension_numbers<[2], [1], [1], [2], [0, 0, 0, 1, 1, 2], [0], [0]>} : vector<4x16x64xbf16>, vector<4x64x16xbf16>, vector<4x16x16xf32> -> vector<4x16x16xf32>
    %c0_13 = arith.constant 0 : index
    %c0_14 = arith.constant 0 : index
    %c0_15 = arith.constant 0 : index
    %21 = vector.load %arg5[%c0_13, %c0_14, %c0_15] : memref<4x64x16xbf16, #tpu.memory_space<vmem>>, vector<4x64x16xbf16>
    %cst_16 = arith.constant dense<0.000000e+00> : vector<4x16x16xf32>
    %22 = tpu.matmul %18, %21, %cst_16 {dimension_numbers = #tpu.dot_dimension_numbers<[2], [1], [1], [2], [0, 0, 0, 1, 1, 2], [0], [0]>} : vector<4x16x64xbf16>, vector<4x64x16xbf16>, vector<4x16x16xf32> -> vector<4x16x16xf32>
    %c0_17 = arith.constant 0 : index
    %c0_18 = arith.constant 0 : index
    %c0_19 = arith.constant 0 : index
    %23 = vector.load %arg6[%c0_17, %c0_18, %c0_19] : memref<4x64x16xbf16, #tpu.memory_space<vmem>>, vector<4x64x16xbf16>
    %cst_20 = arith.constant dense<0.000000e+00> : vector<4x16x16xf32>
    %24 = tpu.matmul %18, %23, %cst_20 {dimension_numbers = #tpu.dot_dimension_numbers<[2], [1], [1], [2], [0, 0, 0, 1, 1, 2], [0], [0]>} : vector<4x16x64xbf16>, vector<4x64x16xbf16>, vector<4x16x16xf32> -> vector<4x16x16xf32>
    %c0_21 = arith.constant 0 : index
    %c0_22 = arith.constant 0 : index
    %c0_23 = arith.constant 0 : index
    %25 = vector.load %arg7[%c0_21, %c0_22, %c0_23] : memref<4x64x16xbf16, #tpu.memory_space<vmem>>, vector<4x64x16xbf16>
    %cst_24 = arith.constant dense<0.000000e+00> : vector<4x16x16xf32>
    %26 = tpu.matmul %18, %25, %cst_24 {dimension_numbers = #tpu.dot_dimension_numbers<[2], [1], [1], [2], [0, 0, 0, 1, 1, 2], [0], [0]>} : vector<4x16x64xbf16>, vector<4x64x16xbf16>, vector<4x16x16xf32> -> vector<4x16x16xf32>
    %c0_25 = arith.constant 0 : index
    %c0_26 = arith.constant 0 : index
    %c0_27 = arith.constant 0 : index
    %27 = vector.load %arg8[%c0_25, %c0_26, %c0_27] : memref<4x64x16xbf16, #tpu.memory_space<vmem>>, vector<4x64x16xbf16>
    %cst_28 = arith.constant dense<0.000000e+00> : vector<4x16x16xf32>
    %28 = tpu.matmul %18, %27, %cst_28 {dimension_numbers = #tpu.dot_dimension_numbers<[2], [1], [1], [2], [0, 0, 0, 1, 1, 2], [0], [0]>} : vector<4x16x64xbf16>, vector<4x64x16xbf16>, vector<4x16x16xf32> -> vector<4x16x16xf32>
    %29 = vector.shape_cast %1 : vector<16x16xf32> to vector<1x16x16xf32>
    %30 = vector.broadcast %29 : vector<1x16x16xf32> to vector<4x16x16xf32>
    %31 = arith.mulf %20, %30 : vector<4x16x16xf32>
    %32 = vector.shape_cast %2 : vector<16x16xf32> to vector<1x16x16xf32>
    %33 = vector.broadcast %32 : vector<1x16x16xf32> to vector<4x16x16xf32>
    %34 = arith.mulf %22, %33 : vector<4x16x16xf32>
    %35 = arith.addf %31, %34 : vector<4x16x16xf32>
    %36 = vector.shape_cast %1 : vector<16x16xf32> to vector<1x16x16xf32>
    %37 = vector.broadcast %36 : vector<1x16x16xf32> to vector<4x16x16xf32>
    %38 = arith.mulf %24, %37 : vector<4x16x16xf32>
    %39 = vector.shape_cast %2 : vector<16x16xf32> to vector<1x16x16xf32>
    %40 = vector.broadcast %39 : vector<1x16x16xf32> to vector<4x16x16xf32>
    %41 = arith.mulf %26, %40 : vector<4x16x16xf32>
    %42 = arith.addf %38, %41 : vector<4x16x16xf32>
    %43 = tpu.iota {dimensions = array<i32: 0>} : vector<16x16xi32>
    %44 = tpu.iota {dimensions = array<i32: 1>} : vector<16x16xi32>
    %c3_i32 = arith.constant 3 : i32
    %45 = vector.broadcast %c3_i32 : i32 to vector<16x16xi32>
    %46 = arith.shrsi %43, %45 : vector<16x16xi32>
    %c3_i32_29 = arith.constant 3 : i32
    %47 = vector.broadcast %c3_i32_29 : i32 to vector<16x16xi32>
    %48 = arith.shrsi %44, %47 : vector<16x16xi32>
    %49 = arith.cmpi eq, %46, %48 : vector<16x16xi32>
    %50 = arith.cmpi sle, %44, %43 : vector<16x16xi32>
    %51 = arith.andi %49, %50 : vector<16x16xi1>
    %cst_30 = arith.constant 0.000000e+00 : f32
    %cst_31 = arith.constant -1.000000e+09 : f32
    %52 = vector.broadcast %cst_30 : f32 to vector<16x16xf32>
    %53 = vector.broadcast %cst_31 : f32 to vector<16x16xf32>
    %54 = arith.select %51, %52, %53 : vector<16x16xi1>, vector<16x16xf32>
    %55 = arith.truncf %35 : vector<4x16x16xf32> to vector<4x16x16xbf16>
    %56 = arith.truncf %42 : vector<4x16x16xf32> to vector<4x16x16xbf16>
    %cst_32 = arith.constant dense<0.000000e+00> : vector<4x16x16xf32>
    %57 = tpu.matmul %55, %56, %cst_32 {dimension_numbers = #tpu.dot_dimension_numbers<[2], [2], [1], [1], [0, 0, 0, 1, 1, 1], [0], [0]>} : vector<4x16x16xbf16>, vector<4x16x16xbf16>, vector<4x16x16xf32> -> vector<4x16x16xf32>
    %cst_33 = arith.constant 2.500000e-01 : f32
    %58 = vector.broadcast %cst_33 : f32 to vector<4x16x16xf32>
    %59 = arith.mulf %57, %58 : vector<4x16x16xf32>
    %60 = vector.shape_cast %54 : vector<16x16xf32> to vector<1x16x16xf32>
    %61 = vector.broadcast %60 : vector<1x16x16xf32> to vector<4x16x16xf32>
    %62 = arith.addf %59, %61 : vector<4x16x16xf32>
    %cst_34 = arith.constant dense<0xFF800000> : vector<4x16xf32>
    %63 = vector.multi_reduction <maximumf>, %62, %cst_34 [2] : vector<4x16x16xf32> to vector<4x16xf32>
    %64 = vector.shape_cast %63 : vector<4x16xf32> to vector<4x16x1xf32>
    %65 = vector.broadcast %64 : vector<4x16x1xf32> to vector<4x16x16xf32>
    %66 = arith.subf %62, %65 : vector<4x16x16xf32>
    %67 = math.exp %66 : vector<4x16x16xf32>
    %cst_35 = arith.constant dense<0.000000e+00> : vector<4x16xf32>
    %68 = vector.multi_reduction <add>, %67, %cst_35 [2] : vector<4x16x16xf32> to vector<4x16xf32>
    %69 = vector.shape_cast %68 : vector<4x16xf32> to vector<4x16x1xf32>
    %70 = tpu.reciprocal %69 {approx = true} : vector<4x16x1xf32> -> vector<4x16x1xf32>
    %71 = vector.broadcast %70 : vector<4x16x1xf32> to vector<4x16x16xf32>
    %72 = arith.mulf %67, %71 : vector<4x16x16xf32>
    %73 = arith.truncf %72 : vector<4x16x16xf32> to vector<4x16x16xbf16>
    %74 = arith.truncf %28 : vector<4x16x16xf32> to vector<4x16x16xbf16>
    %cst_36 = arith.constant dense<0.000000e+00> : vector<4x16x16xf32>
    %75 = tpu.matmul %73, %74, %cst_36 {dimension_numbers = #tpu.dot_dimension_numbers<[2], [1], [1], [2], [0, 0, 0, 1, 1, 2], [0], [0]>} : vector<4x16x16xbf16>, vector<4x16x16xbf16>, vector<4x16x16xf32> -> vector<4x16x16xf32>
    %76 = arith.truncf %75 : vector<4x16x16xf32> to vector<4x16x16xbf16>
    %c0_37 = arith.constant 0 : index
    %c0_38 = arith.constant 0 : index
    %c0_39 = arith.constant 0 : index
    %77 = vector.load %arg9[%c0_37, %c0_38, %c0_39] : memref<4x16x64xbf16, #tpu.memory_space<vmem>>, vector<4x16x64xbf16>
    %cst_40 = arith.constant dense<0.000000e+00> : vector<4x16x64xf32>
    %78 = tpu.matmul %76, %77, %cst_40 {dimension_numbers = #tpu.dot_dimension_numbers<[2], [1], [1], [2], [0, 0, 0, 1, 1, 2], [0], [0]>} : vector<4x16x16xbf16>, vector<4x16x64xbf16>, vector<4x16x64xf32> -> vector<4x16x64xf32>
    %79 = vector.extract_strided_slice %78 {offsets = [0, 0, 0], sizes = [1, 16, 64], strides = [1, 1, 1]} : vector<4x16x64xf32> to vector<1x16x64xf32>
    %80 = vector.shape_cast %79 : vector<1x16x64xf32> to vector<16x64xf32>
    %81 = vector.extract_strided_slice %78 {offsets = [1, 0, 0], sizes = [1, 16, 64], strides = [1, 1, 1]} : vector<4x16x64xf32> to vector<1x16x64xf32>
    %82 = vector.shape_cast %81 : vector<1x16x64xf32> to vector<16x64xf32>
    %83 = arith.addf %80, %82 : vector<16x64xf32>
    %84 = vector.extract_strided_slice %78 {offsets = [2, 0, 0], sizes = [1, 16, 64], strides = [1, 1, 1]} : vector<4x16x64xf32> to vector<1x16x64xf32>
    %85 = vector.shape_cast %84 : vector<1x16x64xf32> to vector<16x64xf32>
    %86 = arith.addf %83, %85 : vector<16x64xf32>
    %87 = vector.extract_strided_slice %78 {offsets = [3, 0, 0], sizes = [1, 16, 64], strides = [1, 1, 1]} : vector<4x16x64xf32> to vector<1x16x64xf32>
    %88 = vector.shape_cast %87 : vector<1x16x64xf32> to vector<16x64xf32>
    %89 = arith.addf %86, %88 : vector<16x64xf32>
    %90 = arith.addf %0, %89 : vector<16x64xf32>
    %c0_41 = arith.constant 0 : index
    %c0_42 = arith.constant 0 : index
    %91 = vector.load %arg10[%c0_41, %c0_42] : memref<1x64xf32, #tpu.memory_space<vmem>>, vector<1x64xf32>
    %92 = arith.mulf %90, %90 : vector<16x64xf32>
    %cst_43 = arith.constant dense<0.000000e+00> : vector<16xf32>
    %93 = vector.multi_reduction <add>, %92, %cst_43 [1] : vector<16x64xf32> to vector<16xf32>
    %94 = vector.shape_cast %93 : vector<16xf32> to vector<16x1xf32>
    %cst_44 = arith.constant 6.400000e+01 : f32
    %95 = vector.broadcast %cst_44 : f32 to vector<16x1xf32>
    %96 = arith.divf %94, %95 : vector<16x1xf32>
    %cst_45 = arith.constant 9.99999997E-7 : f32
    %97 = vector.broadcast %cst_45 : f32 to vector<16x1xf32>
    %98 = arith.addf %96, %97 : vector<16x1xf32>
    %99 = math.rsqrt %98 : vector<16x1xf32>
    %100 = vector.broadcast %99 : vector<16x1xf32> to vector<16x64xf32>
    %101 = arith.mulf %90, %100 : vector<16x64xf32>
    %102 = vector.broadcast %91 : vector<1x64xf32> to vector<16x64xf32>
    %103 = arith.mulf %102, %101 : vector<16x64xf32>
    %104 = arith.truncf %103 : vector<16x64xf32> to vector<16x64xbf16>
    %c0_46 = arith.constant 0 : index
    %c0_47 = arith.constant 0 : index
    %105 = vector.load %arg11[%c0_46, %c0_47] : memref<64x128xbf16, #tpu.memory_space<vmem>>, vector<64x128xbf16>
    %cst_48 = arith.constant dense<0.000000e+00> : vector<16x128xf32>
    %106 = tpu.matmul %104, %105, %cst_48 {dimension_numbers = #tpu.dot_dimension_numbers<[1], [0], [0], [1], [0, 0, 1, 1], [], []>} : vector<16x64xbf16>, vector<64x128xbf16>, vector<16x128xf32> -> vector<16x128xf32>
    %c0_49 = arith.constant 0 : index
    %c0_50 = arith.constant 0 : index
    %107 = vector.load %arg12[%c0_49, %c0_50] : memref<64x128xbf16, #tpu.memory_space<vmem>>, vector<64x128xbf16>
    %cst_51 = arith.constant dense<0.000000e+00> : vector<16x128xf32>
    %108 = tpu.matmul %104, %107, %cst_51 {dimension_numbers = #tpu.dot_dimension_numbers<[1], [0], [0], [1], [0, 0, 1, 1], [], []>} : vector<16x64xbf16>, vector<64x128xbf16>, vector<16x128xf32> -> vector<16x128xf32>
    %109 = arith.negf %106 : vector<16x128xf32>
    %110 = math.exp %109 : vector<16x128xf32>
    %cst_52 = arith.constant 1.000000e+00 : f32
    %111 = vector.broadcast %cst_52 : f32 to vector<16x128xf32>
    %112 = arith.addf %111, %110 : vector<16x128xf32>
    %113 = arith.divf %111, %112 : vector<16x128xf32>
    %114 = arith.mulf %106, %113 : vector<16x128xf32>
    %115 = arith.mulf %114, %108 : vector<16x128xf32>
    %116 = arith.truncf %115 : vector<16x128xf32> to vector<16x128xbf16>
    %c0_53 = arith.constant 0 : index
    %c0_54 = arith.constant 0 : index
    %117 = vector.load %arg13[%c0_53, %c0_54] : memref<128x64xbf16, #tpu.memory_space<vmem>>, vector<128x64xbf16>
    %cst_55 = arith.constant dense<0.000000e+00> : vector<16x64xf32>
    %118 = tpu.matmul %116, %117, %cst_55 {dimension_numbers = #tpu.dot_dimension_numbers<[1], [0], [0], [1], [0, 0, 1, 1], [], []>} : vector<16x128xbf16>, vector<128x64xbf16>, vector<16x64xf32> -> vector<16x64xf32>
    %119 = arith.addf %90, %118 : vector<16x64xf32>
    %c0_56 = arith.constant 0 : index
    %c0_57 = arith.constant 0 : index
    %120 = vector.load %arg14[%c0_56, %c0_57] : memref<16x64xf32, #tpu.memory_space<vmem>>, vector<16x64xf32>
    tpu.vector_store %arg14[%c0_56, %c0_57], %119 {strides = array<i32>} : memref<16x64xf32, #tpu.memory_space<vmem>>, vector<16x64xf32>,
    return
  }
}

</mosaic_0001>

<bundles_post_ra>
// kernel: tpu_custom_call.1
= control target key start
LH: loop header
LB: loop body
LE: loop exit
PB: predicated region body
PF: predicated region fallthrough
CT: control target
= control target key end

     0   :  { %vm58_vm0 = vcmask 523264   ;;  %s3090_s0 = inlined_call_operand.vmem [shape: f32[16,64], index: 0, kind: input, shape index: {}]   ;;  %s3091_s1 = inlined_call_operand.vmem [shape: f32[16,16], index: 1, kind: input, shape index: {}]   ;;  %s3092_s2 = inlined_call_operand.vmem [shape: f32[16,16], index: 2, kind: input, shape index: {}]   ;;  %s3093_s3 = inlined_call_operand.vmem [shape: f32[1,64], index: 3, kind: input, shape index: {}]   ;;  %s3094_s4 = inlined_call_operand.vmem [shape: bf16[4,64,16], index: 4, kind: input, shape index: {}]   ;;  %s3095_s5 = inlined_call_operand.vmem [shape: bf16[4,64,16], index: 5, kind: input, shape index: {}]   ;;  %s3096_s6 = inlined_call_operand.vmem [shape: bf16[4,64,16], index: 6, kind: input, shape index: {}]   ;;  %s3097_s7 = inlined_call_operand.vmem [shape: bf16[4,64,16], index: 7, kind: input, shape index: {}]   ;;  %s3098_s8 = inlined_call_operand.vmem [shape: bf16[4,64,16], index: 8, kind: input, shape index: {}]   ;;  %s3099_s9 = inlined_call_operand.vmem [shape: bf16[4,16,64], index: 9, kind: input, shape index: {}]   ;;  %s3100_s10 = inlined_call_operand.vmem [shape: f32[1,64], index: 10, kind: input, shape index: {}]   ;;  %s3101_s11 = inlined_call_operand.vmem [shape: bf16[64,128], index: 11, kind: input, shape index: {}]   ;;  %s3102_s12 = inlined_call_operand.vmem [shape: bf16[64,128], index: 12, kind: input, shape index: {}]   ;;  %s3103_s13 = inlined_call_operand.vmem [shape: bf16[128,64], index: 13, kind: input, shape index: {}]   ;;  %s3104_s14 = inlined_call_operand.hbm [shape: f32[16,64], index: 14, kind: output, shape index: {}]  }
   0x1   :  { %v2585_v0 = vld [vmem:[%s3090_s0] sm:$0xff] }
   0x2   :  { %v56_v1 = vmul.f32 %v2585_v0, %v2585_v0 }
   0x3   :  { %19 = vsyncpa [#allocation3], 0  ;;  %v2592_v2 = vld [vmem:[%s3090_s0 + $0x8] sm:$0xff]  ;;  %v2502_v6 = vmov 64.0   ;;  %v2320_v11 = vld [vmem:[%s3094_s4 + $0x18] sm:$0xff]  ;;  %vm1123_vm8 = vcmask 130048  }
   0x4   :  { %v59_v3 = vsel %vm58_vm0, %v56_v1, 0.0  ;;  %v57_v4 = vmul.f32 %v2592_v2, %v2592_v2  ;;  %2424 = vrcp.f32 %v2502_v6  ;;  %v2324_v12 = vld [vmem:[%s3094_s4 + $0x38] sm:$0xff]  ;;  %173 = vmatpush.bf16.msra.mxu0 %v2320_v11  ;;  %v2319_v16 = vld [vmem:[%s3094_s4 + $0x10] sm:$0xff]  ;;  %v2318_v22 = vld [vmem:[%s3094_s4 + $0x8] sm:$0xff]  ;;  %s1869_s18 = sshll.u32 %s3104_s14, 4  ;;  %s2506_s19 = smov 8   ;;  %s1870_s18 = int_to_ptr.hbm [resolvable:$true] %s1869_s18 }
   0x5   :  { %60 = vadd.xlane.f32.xlu0 %v59_v3  ;;  %v2328_v13 = vld [vmem:[%s3094_s4 + $0x58] sm:$0xff]  ;;  %211 = vmatpush.bf16.msra.mxu1 %v2324_v12  ;;  %v2323_v17 = vld [vmem:[%s3094_s4 + $0x30] sm:$0xff]  ;;  %v2322_v23 = vld [vmem:[%s3094_s4 + $0x28] sm:$0xff] }
   0x6   :  { %v62_v5 = vsel %vm58_vm0, %v57_v4, 0.0  ;;  %v2344_v14 = vld [vmem:[%s3095_s5 + $0x58] sm:$0xff]  ;;  %249 = vmatpush.bf16.msra.mxu3 %v2328_v13  ;;  %v2327_v18 = vld [vmem:[%s3094_s4 + $0x50] sm:$0xff]  ;;  %v2326_v24 = vld [vmem:[%s3094_s4 + $0x48] sm:$0xff] }
   0x7   :  { %433 = vmatpush.bf16.msra.mxu2 %v2344_v14  ;;  %v2343_v19 = vld [vmem:[%s3095_s5 + $0x50] sm:$0xff]  ;;  %v2342_v26 = vld [vmem:[%s3095_s5 + $0x48] sm:$0xff]  ;;  %v2317_v28 = vld [vmem:[%s3094_s4] sm:$0xff] }
   0x8   :  { %174 = vmatpush.bf16.msra.mxu0 %v2319_v16  ;;  %v2321_v29 = vld [vmem:[%s3094_s4 + $0x20] sm:$0xff]  ;;  %v2332_v34 = vld [vmem:[%s3094_s4 + $0x78] sm:$0xff]  ;;  %v2331_v40 = vld [vmem:[%s3094_s4 + $0x70] sm:$0xff] }
   0x9   :  { %212 = vmatpush.bf16.msra.mxu1 %v2323_v17  ;;  %v2325_v30 = vld [vmem:[%s3094_s4 + $0x40] sm:$0xff]  ;;  %v2336_v35 = vld [vmem:[%s3095_s5 + $0x18] sm:$0xff]  ;;  %v2335_v41 = vld [vmem:[%s3095_s5 + $0x10] sm:$0xff] }
   0xa   :  { %v2425_v7 = vpop.eup %2424  ;;  %250 = vmatpush.bf16.msra.mxu3 %v2327_v18  ;;  %v2341_v31 = vld [vmem:[%s3095_s5 + $0x40] sm:$0xff]  ;;  %v2340_v36 = vld [vmem:[%s3095_s5 + $0x38] sm:$0xff]  ;;  %v2339_v43 = vld [vmem:[%s3095_s5 + $0x30] sm:$0xff] }
   0xb   :  { %v66_v8 = vmul.f32 64.0, %v2425_v7  ;;  %vm70_vm1 = vweird.f32 %v2425_v7  ;;  %434 = vmatpush.bf16.msra.mxu2 %v2343_v19  ;;  %v2360_v37 = vld [vmem:[%s3096_s6 + $0x58] sm:$0xff]  ;;  %v2359_v44 = vld [vmem:[%s3096_s6 + $0x50] sm:$0xff]  ;;  %v2330_v46 = vld [vmem:[%s3094_s4 + $0x68] sm:$0xff] }
   0xc   :  { %175 = vmatpush.bf16.msra.mxu0 %v2318_v22  ;;  %v2334_v47 = vld [vmem:[%s3095_s5 + $0x8] sm:$0xff]  ;;  %v2329_v53 = vld [vmem:[%s3094_s4 + $0x60] sm:$0xff]  ;;  %v2352_v13 = vld [vmem:[%s3096_s6 + $0x18] sm:$0xff] }
   0xd   :  { %63 = vadd.xlane.f32.xlu0 %v62_v5  ;;  %v67_v9 = vsub.f32 1.0, %v66_v8  ;;  %213 = vmatpush.bf16.msra.mxu1 %v2322_v23  ;;  %v2338_v49 = vld [vmem:[%s3095_s5 + $0x28] sm:$0xff]  ;;  %v2333_v54 = vld [vmem:[%s3095_s5] sm:$0xff]  ;;  %v2356_v14 = vld [vmem:[%s3096_s6 + $0x38] sm:$0xff] }
   0xe   :  { %251 = vmatpush.bf16.msra.mxu3 %v2326_v24  ;;  %v2358_v50 = vld [vmem:[%s3096_s6 + $0x48] sm:$0xff]  ;;  %v2337_v57 = vld [vmem:[%s3095_s5 + $0x20] sm:$0xff]  ;;  %v2351_v16 = vld [vmem:[%s3096_s6 + $0x10] sm:$0xff] }
   0xf   :  { %v68_v10 = vmul.f32 %v2425_v7, %v67_v9  ;;  %435 = vmatpush.bf16.msra.mxu2 %v2342_v26  ;;  %v2357_v58 = vld [vmem:[%s3096_s6 + $0x40] sm:$0xff]  ;;  %v2355_v17 = vld [vmem:[%s3096_s6 + $0x30] sm:$0xff]  ;;  %v2346_v19 = vld [vmem:[%s3095_s5 + $0x68] sm:$0xff] }
  0x10   :  { %176 = vmatpush.bf16.msra.mxu0 %v2317_v28  ;;  %v2422_v62 = vld [vmem:[%s3093_s3] ss:$0 sm:$0xff]  ;;  %v2375_v18 = vld [vmem:[%s3097_s7 + $0x50] sm:$0xff]  ;;  %v2354_v22 = vld [vmem:[%s3096_s6 + $0x28] sm:$0xff]  ;;  %s2505_s3 = smov 128  }
  0x11   :  { %v69_v15 = vadd.f32 %v2425_v7, %v68_v10  ;;  %214 = vmatpush.bf16.msra.mxu1 %v2321_v29  ;;  %v2374_v23 = vld [vmem:[%s3097_s7 + $0x48] sm:$0xff]  ;;  %v2345_v24 = vld [vmem:[%s3095_s5 + $0x60] sm:$0xff]  ;;  %v2364_v28 = vld [vmem:[%s3096_s6 + $0x78] sm:$0xff] }
  0x12   :  { %252 = vmatpush.bf16.msra.mxu3 %v2325_v30  ;;  %v2353_v26 = vld [vmem:[%s3096_s6 + $0x20] sm:$0xff]  ;;  %v2368_v29 = vld [vmem:[%s3097_s7 + $0x18] sm:$0xff] }
  0x13   :  { %v2622_v20 = vsel %vm70_vm1, %v2425_v7, %v69_v15  ;;  %436 = vmatpush.bf16.msra.mxu2 %v2341_v31  ;;  %v2347_v15 = vld [vmem:[%s3095_s5 + $0x70] sm:$0xff]  ;;  %v2372_v30 = vld [vmem:[%s3097_s7 + $0x38] sm:$0xff] }
  0x14   :  { %357 = vmatpush.bf16.msrb.mxu0 %v2336_v35  ;;  %v2392_v31 = vld [vmem:[%s3098_s8 + $0x58] sm:$0xff]  ;;  %v2391_v35 = vld [vmem:[%s3098_s8 + $0x50] sm:$0xff] }
  0x15   :  { %395 = vmatpush.bf16.msrb.mxu1 %v2340_v36  ;;  %v2362_v36 = vld [vmem:[%s3096_s6 + $0x68] sm:$0xff] }
  0x16   :  { %287 = vmatpush.bf16.msrb.mxu3 %v2332_v34  ;;  %v2371_v34 = vld [vmem:[%s3097_s7 + $0x30] sm:$0xff] }
  0x17   :  { %617 = vmatpush.bf16.msrb.mxu2 %v2360_v37  ;;  %v2366_v37 = vld [vmem:[%s3097_s7 + $0x8] sm:$0xff] }
  0x18   :  { %358 = vmatpush.bf16.msrb.mxu0 %v2335_v41  ;;  %v2365_v41 = vld [vmem:[%s3097_s7] sm:$0xff] }
  0x19   :  { %396 = vmatpush.bf16.msrb.mxu1 %v2339_v43  ;;  %v2389_v43 = vld [vmem:[%s3098_s8 + $0x40] sm:$0xff] }
  0x1a   :  { %288 = vmatpush.bf16.msrb.mxu3 %v2331_v40  ;;  %v2361_v40 = vld [vmem:[%s3096_s6 + $0x60] sm:$0xff] }
  0x1b   :  { %618 = vmatpush.bf16.msrb.mxu2 %v2359_v44  ;;  %v2380_v44 = vld [vmem:[%s3097_s7 + $0x78] sm:$0xff] }
  0x1c   :  { %359 = vmatpush.bf16.msrb.mxu0 %v2334_v47  ;;  %v2379_v47 = vld [vmem:[%s3097_s7 + $0x70] sm:$0xff] }
  0x1d   :  { %397 = vmatpush.bf16.msrb.mxu1 %v2338_v49  ;;  %v2387_v49 = vld [vmem:[%s3098_s8 + $0x30] sm:$0xff] }
  0x1e   :  { %289 = vmatpush.bf16.msrb.mxu3 %v2330_v46  ;;  %v2388_v46 = vld [vmem:[%s3098_s8 + $0x38] sm:$0xff] }
  0x1f   :  { %619 = vmatpush.bf16.msrb.mxu2 %v2358_v50  ;;  %v2378_v50 = vld [vmem:[%s3097_s7 + $0x68] sm:$0xff] }
  0x20   :  { %360 = vmatpush.bf16.msrb.mxu0 %v2333_v54  ;;  %v2381_v54 = vld [vmem:[%s3098_s8] sm:$0xff] }
  0x21   :  { %398 = vmatpush.bf16.msrb.mxu1 %v2337_v57  ;;  %v2395_v57 = vld [vmem:[%s3098_s8 + $0x70] sm:$0xff] }
  0x22   :  { %290 = vmatpush.bf16.msrb.mxu3 %v2329_v53  ;;  %v2377_v53 = vld [vmem:[%s3097_s7 + $0x60] sm:$0xff] }
  0x23   :  { %620 = vmatpush.bf16.msrb.mxu2 %v2357_v58  ;;  %v2394_v58 = vld [vmem:[%s3098_s8 + $0x68] sm:$0xff] }
  0x78   :  { %v61_v21 = vpop.xlane.xlu0 %60 }
  0x79   :  { %v72_v25 = vmul.f32 %v2622_v20, %v61_v21  ;;  %v2350_v21 = vld [vmem:[%s3096_s6 + $0x8] sm:$0xff] }
  0x7b   :  { %v74_v27 = vadd.f32 1e-06, %v72_v25  ;;  %v2349_v25 = vld [vmem:[%s3096_s6] sm:$0xff] }
  0x7d   :  { %2426 = vrsqrt.f32 %v74_v27  ;;  %vm82_vm3 = vweird.f32 %v74_v27 }
  0x80   :  { %v64_v32 = vpop.xlane.xlu0 %63 }
  0x81   :  { %v73_v33 = vmul.f32 %v2622_v20, %v64_v32  ;;  %v2363_v32 = vld [vmem:[%s3096_s6 + $0x70] sm:$0xff] }
  0x83   :  { %v2427_v38 = vpop.eup %2426  ;;  %v75_v39 = vadd.f32 1e-06, %v73_v33  ;;  %v2367_v33 = vld [vmem:[%s3097_s7 + $0x10] sm:$0xff] }
  0x84   :  { %v77_v42 = vmul.f32 %v2427_v38, %v74_v27  ;;  %vm83_vm2 = vweird.f32 %v2427_v38  ;;  %v2373_v27 = vld [vmem:[%s3097_s7 + $0x40] sm:$0xff] }
  0x85   :  { %2428 = vrsqrt.f32 %v75_v39  ;;  %vm84_vm4 = vmor %vm82_vm3, %vm83_vm2  ;;  %vm92_vm6 = vweird.f32 %v75_v39 }
  0x86   :  { %v78_v45 = vmul.f32 %v2427_v38, %v77_v42  ;;  %v2369_v42 = vld [vmem:[%s3097_s7 + $0x20] sm:$0xff] }
  0x88   :  { %v79_v48 = vmul.f32 0.5, %v78_v45  ;;  %v2384_v45 = vld [vmem:[%s3098_s8 + $0x18] sm:$0xff] }
  0x8a   :  { %v80_v51 = vsub.f32 1.5, %v79_v48  ;;  %v2383_v48 = vld [vmem:[%s3098_s8 + $0x10] sm:$0xff] }
  0x8b   :  { %v2429_v52 = vpop.eup %2428 }
  0x8c   :  { %v81_v55 = vmul.f32 %v2427_v38, %v80_v51  ;;  %v87_v56 = vmul.f32 %v2429_v52, %v75_v39  ;;  %vm93_vm5 = vweird.f32 %v2429_v52  ;;  %v2390_v39 = vld [vmem:[%s3098_s8 + $0x48] sm:$0xff] }
  0x8d   :  { %vm94_vm7 = vmor %vm92_vm6, %vm93_vm5  ;;  %v2382_v51 = vld [vmem:[%s3098_s8 + $0x8] sm:$0xff] }
  0x8e   :  { %v85_v59 = vsel %vm84_vm4, %v2427_v38, %v81_v55  ;;  %v88_v60 = vmul.f32 %v2429_v52, %v87_v56  ;;  %v2370_v38 = vld [vmem:[%s3097_s7 + $0x28] sm:$0xff]  ;;  %v2385_v55 = vld [vmem:[%s3098_s8 + $0x20] sm:$0xff]  ;;  %v2396_v56 = vld [vmem:[%s3098_s8 + $0x78] sm:$0xff] }
  0x8f   :  { %v96_v63 = vmul.f32 %v85_v59, %v2585_v0  ;;  %v2348_v0 = vld [vmem:[%s3095_s5 + $0x78] sm:$0xff]  ;;  %v2393_v59 = vld [vmem:[%s3098_s8 + $0x60] sm:$0xff] }
  0x90   :  { %v89_v61 = vmul.f32 0.5, %v88_v60 }
  0x91   :  { %v101_v4 = vmul.f32 %v2422_v62, %v96_v63 }
  0x92   :  { %v90_v1 = vsub.f32 1.5, %v89_v61 }
  0x93   :  { %v103_v7 = vpack.c.bf16 %v101_v4, %v101_v4 }
  0x94   :  { %v91_v3 = vmul.f32 %v2429_v52, %v90_v1 }
  0x95   :  { %v139_v10 = vunpack.c.l.b16 %v103_v7 }
  0x96   :  { %v95_v5 = vsel %vm94_vm7, %v2429_v52, %v91_v3  ;;  %v2386_v52 = vld [vmem:[%s3098_s8 + $0x28] sm:$0xff] }
  0x97   :  { %v97_v6 = vmul.f32 %v95_v5, %v2592_v2  ;;  %v2376_v2 = vld [vmem:[%s3097_s7 + $0x58] sm:$0xff] }
  0x99   :  { %v102_v8 = vmul.f32 %v2422_v62, %v97_v6 }
  0x9b   :  { %v104_v9 = vpack.c.bf16 %v102_v8, %v102_v8 }
  0x9d   :  { %v140_v11 = vunpack.c.l.b16 %v104_v9 }
  0x9f   :  { %v2703_v12 = vpack.c.b16 %v140_v11, %v139_v10 }
  0xa1   :  { %1897 = vmatmul.msk.bf16.vlgmr.msra.gmra.mxu0 %vm58_vm0, %v2703_v12  ;;  %1914 = vmatmul.msk.bf16.vlgmr.msra.gmra.mxu1 %vm58_vm0, %v2703_v12 }
  0xa2   :  { %1931 = vmatmul.msk.bf16.vlgmr.msra.gmra.mxu3 %vm58_vm0, %v2703_v12  ;;  %1999 = vmatmul.msk.bf16.vlgmr.msra.gmra.mxu2 %vm58_vm0, %v2703_v12 }
  0xa3   :  { %471 = vmatpush.bf16.msra.mxu3 %v2348_v0  ;;  %541 = vmatpush.bf16.msra.mxu0 %v2352_v13 }
  0xa4   :  { %579 = vmatpush.bf16.msra.mxu1 %v2356_v14  ;;  %801 = vmatpush.bf16.msra.mxu2 %v2376_v2 }
  0xa7   :  { %472 = vmatpush.bf16.msra.mxu3 %v2347_v15  ;;  %542 = vmatpush.bf16.msra.mxu0 %v2351_v16 }
  0xa8   :  { %580 = vmatpush.bf16.msra.mxu1 %v2355_v17  ;;  %802 = vmatpush.bf16.msra.mxu2 %v2375_v18  ;;  %v2902_v18 = vld [vmem:[%s3092_s2] sm:$0xff] }
  0xab   :  { %473 = vmatpush.bf16.msra.mxu3 %v2346_v19  ;;  %543 = vmatpush.bf16.msra.mxu0 %v2350_v21  ;;  %v2908_v21 = vld [vmem:[%s3091_s1] sm:$0xff] }
  0xac   :  { %581 = vmatpush.bf16.msra.mxu1 %v2354_v22  ;;  %803 = vmatpush.bf16.msra.mxu2 %v2374_v23  ;;  %v2914_v23 = vld [vmem:[%s3092_s2 + $0x8] sm:$0xff] }
  0xaf   :  { %474 = vmatpush.bf16.msra.mxu3 %v2345_v24  ;;  %544 = vmatpush.bf16.msra.mxu0 %v2349_v25  ;;  %v2919_v25 = vld [vmem:[%s3091_s1 + $0x8] sm:$0xff] }
  0xb0   :  { %582 = vmatpush.bf16.msra.mxu1 %v2353_v26  ;;  %804 = vmatpush.bf16.msra.mxu2 %v2373_v27 }
  0xb1   :  { %1965 = vmatmul.msk.bf16.vlgmr.msrb.gmra.mxu0 %vm58_vm0, %v2703_v12  ;;  %1982 = vmatmul.msk.bf16.vlgmr.msrb.gmra.mxu1 %vm58_vm0, %v2703_v12 }
  0xb2   :  { %1948 = vmatmul.msk.bf16.vlgmr.msrb.gmra.mxu3 %vm58_vm0, %v2703_v12  ;;  %2067 = vmatmul.msk.bf16.vlgmr.msrb.gmra.mxu2 %vm58_vm0, %v2703_v12 }
  0xb3   :  { %655 = vmatpush.bf16.msrb.mxu3 %v2364_v28  ;;  %725 = vmatpush.bf16.msrb.mxu0 %v2368_v29 }
  0xb4   :  { %763 = vmatpush.bf16.msrb.mxu1 %v2372_v30  ;;  %985 = vmatpush.bf16.msrb.mxu2 %v2392_v31 }
  0xb7   :  { %656 = vmatpush.bf16.msrb.mxu3 %v2363_v32  ;;  %726 = vmatpush.bf16.msrb.mxu0 %v2367_v33 }
  0xb8   :  { %764 = vmatpush.bf16.msrb.mxu1 %v2371_v34  ;;  %986 = vmatpush.bf16.msrb.mxu2 %v2391_v35 }
  0xbb   :  { %657 = vmatpush.bf16.msrb.mxu3 %v2362_v36  ;;  %727 = vmatpush.bf16.msrb.mxu0 %v2366_v37 }
  0xbc   :  { %765 = vmatpush.bf16.msrb.mxu1 %v2370_v38  ;;  %987 = vmatpush.bf16.msrb.mxu2 %v2390_v39 }
  0xbf   :  { %658 = vmatpush.bf16.msrb.mxu3 %v2361_v40  ;;  %728 = vmatpush.bf16.msrb.mxu0 %v2365_v41 }
  0xc0   :  { %766 = vmatpush.bf16.msrb.mxu1 %v2369_v42  ;;  %988 = vmatpush.bf16.msrb.mxu2 %v2389_v43 }
  0xc1   :  { %2033 = vmatmul.msk.bf16.vlgmr.msra.gmra.mxu0 %vm58_vm0, %v2703_v12  ;;  %2050 = vmatmul.msk.bf16.vlgmr.msra.gmra.mxu1 %vm58_vm0, %v2703_v12 }
  0xc2   :  { %2016 = vmatmul.msk.bf16.vlgmr.msra.gmra.mxu3 %vm58_vm0, %v2703_v12  ;;  %2135 = vmatmul.msk.bf16.vlgmr.msra.gmra.mxu2 %vm58_vm0, %v2703_v12 }
  0xc3   :  { %839 = vmatpush.bf16.msra.mxu3 %v2380_v44  ;;  %909 = vmatpush.bf16.msra.mxu0 %v2384_v45 }
  0xc4   :  { %947 = vmatpush.bf16.msra.mxu1 %v2388_v46 }
  0xc7   :  { %840 = vmatpush.bf16.msra.mxu3 %v2379_v47  ;;  %910 = vmatpush.bf16.msra.mxu0 %v2383_v48 }
  0xc8   :  { %948 = vmatpush.bf16.msra.mxu1 %v2387_v49 }
  0xcb   :  { %841 = vmatpush.bf16.msra.mxu3 %v2378_v50  ;;  %911 = vmatpush.bf16.msra.mxu0 %v2382_v51 }
  0xcc   :  { %949 = vmatpush.bf16.msra.mxu1 %v2386_v52 }
  0xcf   :  { %842 = vmatpush.bf16.msra.mxu3 %v2377_v53  ;;  %912 = vmatpush.bf16.msra.mxu0 %v2381_v54 }
  0xd0   :  { %950 = vmatpush.bf16.msra.mxu1 %v2385_v55 }
  0xd1   :  { %2101 = vmatmul.msk.bf16.vlgmr.msrb.gmra.mxu0 %vm58_vm0, %v2703_v12  ;;  %2118 = vmatmul.msk.bf16.vlgmr.msrb.gmra.mxu1 %vm58_vm0, %v2703_v12 }
  0xd2   :  { %2084 = vmatmul.msk.bf16.vlgmr.msrb.gmra.mxu3 %vm58_vm0, %v2703_v12  ;;  %2203 = vmatmul.msk.bf16.vlgmr.msrb.gmra.mxu2 %vm58_vm0, %v2703_v12 }
  0xd3   :  { %1023 = vmatpush.bf16.msrb.mxu3 %v2396_v56 }
  0xd7   :  { %1024 = vmatpush.bf16.msrb.mxu3 %v2395_v57 }
  0xdb   :  { %1025 = vmatpush.bf16.msrb.mxu3 %v2394_v58 }
  0xdf   :  { %1026 = vmatpush.bf16.msrb.mxu3 %v2393_v59 }
  0xe1   :  { %2169 = vmatmul.msk.bf16.vlgmr.msra.gmra.mxu0 %vm58_vm0, %v2703_v12  ;;  %2186 = vmatmul.msk.bf16.vlgmr.msra.gmra.mxu1 %vm58_vm0, %v2703_v12 }
  0xe2   :  { %2152 = vmatmul.msk.bf16.vlgmr.msra.gmra.mxu3 %vm58_vm0, %v2703_v12 }
  0xf2   :  { %2220 = vmatmul.msk.bf16.vlgmr.msrb.gmra.mxu3 %vm58_vm0, %v2703_v12 }
 0x11e   :  { %v2889_v60 = vpop.f32.mrf.mxu0  ;;  %v2891_v61 = vpop.f32.mrf.mxu1 }
 0x125   :  { %v254_v62 = vpop.f32.mrf.mxu3  ;;  %v438_v63 = vpop.f32.mrf.mxu2 }
 0x126   :  { %v180_v1 = vpop.f32.mrf.mxu0  ;;  %v218_v3 = vpop.f32.mrf.mxu1  ;;  %v1037_v34 = vmul.f32 %v254_v62, %v2908_v21  ;;  %v1045_v35 = vmul.f32 %v438_v63, %v2902_v18 }
 0x127   :  { %v1034_v45 = vmul.f32 %v180_v1, %v2919_v25  ;;  %v1036_v48 = vmul.f32 %v218_v3, %v2919_v25 }
 0x128   :  { %v1053_v44 = vadd.f32 %v1045_v35, %v1037_v34 }
 0x12a   :  { %v1101_v3 = vpack.c.bf16 %v1053_v44, %v1053_v44 }
 0x12d   :  { %v256_v4 = vpop.f32.mrf.mxu3  ;;  %v440_v5 = vpop.f32.mrf.mxu2 }
 0x12e   :  { %v362_v6 = vpop.f32.mrf.mxu0  ;;  %v400_v7 = vpop.f32.mrf.mxu1  ;;  %v1038_v28 = vmul.f32 %v256_v4, %v2919_v25  ;;  %v1046_v29 = vmul.f32 %v440_v5, %v2914_v23 }
 0x12f   :  { %v1041_v4 = vmul.f32 %v362_v6, %v2902_v18  ;;  %v1043_v5 = vmul.f32 %v400_v7, %v2902_v18 }
 0x130   :  { %v1054_v40 = vadd.f32 %v1046_v29, %v1038_v28 }
 0x132   :  { %v1102_v53 = vpack.c.bf16 %v1054_v40, %v1054_v40 }
 0x135   :  { %v2893_v8 = vpop.f32.mrf.mxu3  ;;  %v622_v9 = vpop.f32.mrf.mxu2 }
 0x136   :  { %v364_v10 = vpop.f32.mrf.mxu0  ;;  %v402_v11 = vpop.f32.mrf.mxu1  ;;  %v1061_v22 = vmul.f32 %v622_v9, %v2908_v21 }
 0x137   :  { %v1042_v54 = vmul.f32 %v364_v10, %v2914_v23  ;;  %v1044_v55 = vmul.f32 %v402_v11, %v2914_v23 }
 0x13d   :  { %v2895_v0 = vpop.f32.mrf.mxu3  ;;  %v624_v12 = vpop.f32.mrf.mxu2 }
 0x13e   :  { %v546_v13 = vpop.f32.mrf.mxu0  ;;  %v584_v14 = vpop.f32.mrf.mxu1  ;;  %v1062_v30 = vmul.f32 %v624_v12, %v2919_v25 }
 0x13f   :  { %v1057_v42 = vmul.f32 %v546_v13, %v2908_v21  ;;  %v1059_v43 = vmul.f32 %v584_v14, %v2908_v21  ;;  %v1033_v14 = vmul.f32 %v2889_v60, %v2908_v21 }
 0x141   :  { %v1049_v7 = vadd.f32 %v1041_v4, %v1033_v14 }
 0x145   :  { %v2897_v2 = vpop.f32.mrf.mxu3  ;;  %v806_v15 = vpop.f32.mrf.mxu2 }
 0x146   :  { %v548_v16 = vpop.f32.mrf.mxu0  ;;  %v586_v17 = vpop.f32.mrf.mxu1  ;;  %v1069_v19 = vmul.f32 %v806_v15, %v2902_v18  ;;  %v1035_v15 = vmul.f32 %v2891_v61, %v2908_v21 }
 0x147   :  { %v1058_v59 = vmul.f32 %v548_v16, %v2919_v25  ;;  %v1060_v62 = vmul.f32 %v586_v17, %v2919_v25  ;;  %v1177_v16 = vunpack.c.l.b16 %v1102_v53  ;;  %v1050_v17 = vadd.f32 %v1042_v54, %v1034_v45 }
 0x148   :  { %v1077_v24 = vadd.f32 %v1069_v19, %v1061_v22  ;;  %v1052_v19 = vadd.f32 %v1044_v55, %v1036_v48 }
 0x149   :  { %v1098_v61 = vpack.c.bf16 %v1050_v17, %v1050_v17 }
 0x14a   :  { %v1109_v36 = vpack.c.bf16 %v1077_v24, %v1077_v24  ;;  %v1176_v24 = vunpack.c.l.b16 %v1101_v3 }
 0x14b   :  { %v1116_v48 = vunpack.c.l.b16 %v1098_v61 }
 0x14c   :  { %v1181_v46 = vunpack.c.l.b16 %v1109_v36  ;;  %v1178_v35 = vpack.c.b16 %v1177_v16, %v1176_v24  ;;  %v1039_v24 = vmul.f32 %v2893_v8, %v2908_v21 }
 0x14d   :  { %v2921_v26 = vpop.f32.mrf.mxu3  ;;  %v808_v27 = vpop.f32.mrf.mxu2 }
 0x14e   :  { %v1070_v31 = vmul.f32 %v808_v27, %v2914_v23  ;;  %v730_v32 = vpop.f32.mrf.mxu0  ;;  %v768_v33 = vpop.f32.mrf.mxu1  ;;  %v1051_v27 = vadd.f32 %v1043_v5, %v1035_v15  ;;  %v1048_v15 = vmul.f32 %v2921_v26, %v2914_v23 }
 0x14f   :  { %v1065_v38 = vmul.f32 %v730_v32, %v2902_v18  ;;  %v1067_v39 = vmul.f32 %v768_v33, %v2902_v18 }
 0x150   :  { %v1078_v37 = vadd.f32 %v1070_v31, %v1062_v30  ;;  %v1099_v44 = vpack.c.bf16 %v1051_v27, %v1051_v27 }
 0x151   :  { %v1073_v49 = vadd.f32 %v1065_v38, %v1057_v42  ;;  %v1075_v50 = vadd.f32 %v1067_v39, %v1059_v43  ;;  %v1100_v38 = vpack.c.bf16 %v1052_v19, %v1052_v19  ;;  %v1097_v43 = vpack.c.bf16 %v1049_v7, %v1049_v7 }
 0x152   :  { %v1110_v41 = vpack.c.bf16 %v1078_v37, %v1078_v37  ;;  %v1040_v19 = vmul.f32 %v2895_v0, %v2919_v25 }
 0x153   :  { %v1105_v10 = vpack.c.bf16 %v1073_v49, %v1073_v49  ;;  %v1107_v11 = vpack.c.bf16 %v1075_v50, %v1075_v50  ;;  %v1147_v49 = vunpack.c.l.b16 %v1100_v38  ;;  %v1115_v50 = vunpack.c.l.b16 %v1097_v43 }
 0x154   :  { %v1182_v47 = vunpack.c.l.b16 %v1110_v41  ;;  %v1056_v7 = vadd.f32 %v1048_v15, %v1040_v19  ;;  %v2503_v43 = vmov -1e+09  }
 0x155   :  { %v2935_v51 = vpop.f32.mrf.mxu3  ;;  %v990_v52 = vpop.f32.mrf.mxu2  ;;  %v1120_v29 = vunpack.c.l.b16 %v1105_v10  ;;  %v1151_v30 = vunpack.c.l.b16 %v1107_v11 }
 0x156   :  { %v732_v56 = vpop.f32.mrf.mxu0  ;;  %v770_v57 = vpop.f32.mrf.mxu1  ;;  %v1183_v58 = vpack.c.b16 %v1182_v47, %v1181_v46  ;;  %v1350_v28 = vpack.c.bf16 %v990_v52, %v990_v52  ;;  %v1146_v52 = vunpack.c.l.b16 %v1099_v44  ;;  %v1063_v10 = vmul.f32 %v2935_v51, %v2908_v21 }
 0x157   :  { %v1066_v63 = vmul.f32 %v732_v56, %v2914_v23  ;;  %v1068_v1 = vmul.f32 %v770_v57, %v2914_v23 }
 0x158   :  { %v1188_v9 = vsel %vm1123_vm8, %v1183_v58, 0  ;;  %v1417_v41 = vunpack.c.l.b16 %v1350_v28  ;;  %v1117_v58 = vpack.c.b16 %v1116_v48, %v1115_v50 }
 0x159   :  { %v1074_v12 = vadd.f32 %v1066_v63, %v1058_v59  ;;  %v1076_v13 = vadd.f32 %v1068_v1, %v1060_v62  ;;  %1197 = vmatpush.bf16.xpose.msra.mxu2 %v1188_v9  ;;  %v1148_v59 = vpack.c.b16 %v1147_v49, %v1146_v52 }
 0x15b   :  { %v1106_v22 = vpack.c.bf16 %v1074_v12, %v1074_v12  ;;  %v1108_v6 = vpack.c.bf16 %v1076_v13, %v1076_v13 }
 0x15d   :  { %v1121_v31 = vunpack.c.l.b16 %v1106_v22  ;;  %v1152_v32 = vunpack.c.l.b16 %v1108_v6  ;;  %v662_v33 = vpop.f32.mrf.mxu3  ;;  %v992_v34 = vpop.f32.mrf.mxu2  ;;  %v1047_v22 = vmul.f32 %v2897_v2, %v2902_v18 }
 0x15e   :  { %v1351_v60 = vpack.c.bf16 %v992_v34, %v992_v34  ;;  %v914_v36 = vpop.f32.mrf.mxu0  ;;  %v952_v37 = vpop.f32.mrf.mxu1  ;;  %v1064_v16 = vmul.f32 %v662_v33, %v2919_v25 }
 0x15f   :  { %v1122_v39 = vpack.c.b16 %v1121_v31, %v1120_v29  ;;  %v1153_v40 = vpack.c.b16 %v1152_v32, %v1151_v30  ;;  %v1346_v53 = vpack.c.bf16 %v914_v36, %v914_v36  ;;  %v1348_v54 = vpack.c.bf16 %v952_v37, %v952_v37 }
 0x160   :  { %v1418_v42 = vunpack.c.l.b16 %v1351_v60  ;;  %2223 = vmatmul.msk.bf16.vlgmr.msra.gmra.mxu2 %vm1123_vm8, %v1178_v35  ;;  %v1055_v28 = vadd.f32 %v1047_v22, %v1039_v24  ;;  %v1104_v31 = vpack.c.bf16 %v1056_v7, %v1056_v7  ;;  %v1081_v36 = vlaneseq }
 0x161   :  { %v1128_v45 = vsel %vm1123_vm8, %v1122_v39, 0  ;;  %v1158_v46 = vsel %vm1123_vm8, %v1153_v40, 0  ;;  %v1361_v3 = vunpack.c.l.b16 %v1346_v53  ;;  %v1389_v4 = vunpack.c.l.b16 %v1348_v54 }
 0x162   :  { %v1419_v47 = vpack.c.b16 %v1418_v42, %v1417_v41  ;;  %1137 = vmatpush.bf16.xpose.msrb.mxu0 %v1128_v45  ;;  %1167 = vmatpush.bf16.xpose.msrb.mxu1 %v1158_v46  ;;  %v1207_v0 = vunpack.c.l.b16 %v1104_v31  ;;  %v1082_v37 = vshrl.u32 %v1081_v36, 7  ;;  %v1085_v61 = vand.u32 127, %v1081_v36 }
 0x164   :  { %1431 = vmatpush.bf16.msrb.mxu2 %v1419_v47  ;;  %v1086_v38 = vshra.s32 %v1082_v37, 3  ;;  %v1088_v39 = vshra.s32 %v1085_v61, 3  ;;  %vm1091_vm10 = vcmp.le.s32.totalorder %v1085_v61, %v1082_v37  ;;  %v1083_v40 = vadd.s32 8, %v1082_v37 }
 0x165   :  { %v844_v55 = vpop.f32.mrf.mxu3 }
 0x166   :  { %v916_v56 = vpop.f32.mrf.mxu0  ;;  %v954_v57 = vpop.f32.mrf.mxu1  ;;  %v1071_v1 = vmul.f32 %v844_v55, %v2902_v18  ;;  %vm1089_vm9 = vcmp.eq.s32.totalorder %v1086_v38, %v1088_v39  ;;  %v1087_v41 = vshra.s32 %v1083_v40, 3  ;;  %vm1092_vm13 = vcmp.le.s32.totalorder %v1085_v61, %v1083_v40 }
 0x167   :  { %v1347_v62 = vpack.c.bf16 %v916_v56, %v916_v56  ;;  %v1349_v63 = vpack.c.bf16 %v954_v57, %v954_v57  ;;  %vm1093_vm11 = vmand %vm1089_vm9, %vm1091_vm10 }
 0x168   :  { %v1079_v13 = vadd.f32 %v1071_v1, %v1063_v10  ;;  %v1095_v44 = vsel %vm1093_vm11, 0.0, %v2503_v43  ;;  %vm1090_vm12 = vcmp.eq.s32.totalorder %v1087_v41, %v1088_v39 }
 0x169   :  { %v1362_v5 = vunpack.c.l.b16 %v1347_v62  ;;  %v1390_v9 = vunpack.c.l.b16 %v1349_v63  ;;  %2221 = vmatmul.msk.bf16.vlgmr.msrb.gmra.mxu0 %vm1123_vm8, %v1117_v58  ;;  %2222 = vmatmul.msk.bf16.vlgmr.msrb.gmra.mxu1 %vm1123_vm8, %v1148_v59  ;;  %vm1094_vm14 = vmand %vm1090_vm12, %vm1092_vm13 }
 0x16a   :  { %v1111_v51 = vpack.c.bf16 %v1079_v13, %v1079_v13  ;;  %v1096_v55 = vsel %vm1094_vm14, 0.0, %v2503_v43 }
 0x16b   :  { %v1363_v11 = vpack.c.b16 %v1362_v5, %v1361_v3  ;;  %v1391_v12 = vpack.c.b16 %v1390_v9, %v1389_v4 }
 0x16c   :  { %v1211_v29 = vunpack.c.l.b16 %v1111_v51 }
 0x16d   :  { %v846_v14 = vpop.f32.mrf.mxu3  ;;  %1375 = vmatpush.bf16.msra.mxu0 %v1363_v11  ;;  %1403 = vmatpush.bf16.msra.mxu1 %v1391_v12 }
 0x16e   :  { %v1072_v17 = vmul.f32 %v846_v14, %v2914_v23  ;;  %v1103_v23 = vpack.c.bf16 %v1055_v28, %v1055_v28 }
 0x170   :  { %v1080_v6 = vadd.f32 %v1072_v17, %v1064_v16  ;;  %v1206_v25 = vunpack.c.l.b16 %v1103_v23 }
 0x172   :  { %v1112_v27 = vpack.c.bf16 %v1080_v6, %v1080_v6  ;;  %v1208_v34 = vpack.c.b16 %v1207_v0, %v1206_v25 }
 0x174   :  { %v1212_v26 = vunpack.c.l.b16 %v1112_v27 }
 0x175   :  { %v1028_v30 = vpop.f32.mrf.mxu3 }
 0x176   :  { %v1213_v32 = vpack.c.b16 %v1212_v26, %v1211_v29  ;;  %v1352_v2 = vpack.c.bf16 %v1028_v30, %v1028_v30 }
 0x178   :  { %v1218_v33 = vsel %vm1123_vm8, %v1213_v32, 0  ;;  %v1445_v60 = vunpack.c.l.b16 %v1352_v2 }
 0x179   :  { %1227 = vmatpush.bf16.xpose.msra.mxu3 %v1218_v33 }
 0x17d   :  { %v1030_v18 = vpop.f32.mrf.mxu3 }
 0x17e   :  { %v1353_v35 = vpack.c.bf16 %v1030_v18, %v1030_v18 }
 0x180   :  { %v1446_v8 = vunpack.c.l.b16 %v1353_v35  ;;  %2224 = vmatmul.msk.bf16.vlgmr.msra.gmra.mxu3 %vm1123_vm8, %v1208_v34 }
 0x182   :  { %v1447_v21 = vpack.c.b16 %v1446_v8, %v1445_v60 }
 0x184   :  { %1459 = vmatpush.bf16.msrb.mxu3 %v1447_v21 }
 0x1e3   :  { %v1199_v42 = vpop.f32.mrf.mxu2 }
 0x1e4   :  { %v1238_v45 = vmul.f32 0.25, %v1199_v42 }
 0x1e6   :  { %v1139_v46 = vpop.f32.mrf.mxu0  ;;  %v1169_v47 = vpop.f32.mrf.mxu1  ;;  %v1246_v48 = vadd.f32 %v1238_v45, %v1095_v44 }
 0x1e7   :  { %v1234_v49 = vmul.f32 0.25, %v1139_v46  ;;  %v1236_v17 = vmul.f32 0.25, %v1169_v47 }
 0x1e8   :  { %v1262_v50 = vsel %vm1123_vm8, %v1246_v48, -inf }
 0x1e9   :  { %1263 = vmax.xlane.f32.xlu1 %v1262_v50  ;;  %v1242_v52 = vadd.f32 %v1234_v49, %v1095_v44  ;;  %v1244_v22 = vadd.f32 %v1236_v17, %v1095_v44 }
 0x1eb   :  { %v1201_v53 = vpop.f32.mrf.mxu2  ;;  %v1250_v54 = vsel %vm1123_vm8, %v1242_v52, -inf  ;;  %v1256_v51 = vsel %vm1123_vm8, %v1244_v22, -inf }
 0x1ec   :  { %v1239_v56 = vmul.f32 0.25, %v1201_v53  ;;  %1251 = vmax.xlane.f32.xlu0 %v1250_v54 }
 0x1ee   :  { %v1141_v57 = vpop.f32.mrf.mxu0  ;;  %v1171_v58 = vpop.f32.mrf.mxu1  ;;  %v1247_v59 = vadd.f32 %v1239_v56, %v1096_v55 }
 0x1ef   :  { %v1237_v62 = vmul.f32 0.25, %v1171_v58  ;;  %v1235_v63 = vmul.f32 0.25, %v1141_v57 }
 0x1f0   :  { %v1265_v1 = vsel %vm1123_vm8, %v1247_v59, -inf }
 0x1f1   :  { %1266 = vmax.xlane.f32.xlu1 %v1265_v1  ;;  %v1245_v3 = vadd.f32 %v1237_v62, %v1096_v55  ;;  %v1243_v5 = vadd.f32 %v1235_v63, %v1096_v55 }
 0x1f3   :  { %v1259_v4 = vsel %vm1123_vm8, %v1245_v3, -inf  ;;  %v1253_v9 = vsel %vm1123_vm8, %v1243_v5, -inf }
 0x1f4   :  { %1260 = vmax.xlane.f32.xlu0 %v1259_v4 }
 0x1f9   :  { %1254 = vmax.xlane.f32.xlu1 %v1253_v9 }
 0x203   :  { %v1229_v10 = vpop.f32.mrf.mxu3 }
 0x204   :  { %v1240_v11 = vmul.f32 0.25, %v1229_v10 }
 0x206   :  { %v1248_v12 = vadd.f32 %v1240_v11, %v1095_v44 }
 0x208   :  { %v1268_v13 = vsel %vm1123_vm8, %v1248_v12, -inf }
 0x209   :  { %1269 = vmax.xlane.f32.xlu2 %v1268_v13 }
 0x20b   :  { %v1231_v14 = vpop.f32.mrf.mxu3 }
 0x20c   :  { %v1241_v15 = vmul.f32 0.25, %v1231_v14 }
 0x20e   :  { %v1249_v16 = vadd.f32 %v1241_v15, %v1096_v55 }
 0x210   :  { %v1271_v19 = vsel %vm1123_vm8, %v1249_v16, -inf }
 0x211   :  { %1272 = vmax.xlane.f32.xlu2 %v1271_v19 }
 0x219   :  { %1257 = vmax.xlane.f32.xlu2 %v1256_v51 }
 0x25c   :  { %v1264_v6 = vpop.xlane.xlu1 %1263 }
 0x25d   :  { %v1278_v24 = vsub.f32 %v1246_v48, %v1264_v6 }
 0x25f   :  { %v1290_v7 = vmul.f32 1.442695, %v1278_v24  ;;  %v1252_v27 = vpop.xlane.xlu0 %1251 }
 0x260   :  { %v1274_v30 = vsub.f32 %v1242_v52, %v1252_v27 }
 0x261   :  { %2430 = vpow2.f32 %v1290_v7 }
 0x262   :  { %v1282_v23 = vmul.f32 1.442695, %v1274_v30 }
 0x264   :  { %v1267_v28 = vpop.xlane.xlu1 %1266 }
 0x265   :  { %v1279_v29 = vsub.f32 %v1247_v59, %v1267_v28 }
 0x267   :  { %v2431_v26 = vpop.eup %2430  ;;  %v1292_v31 = vmul.f32 1.442695, %v1279_v29  ;;  %v1261_v33 = vpop.xlane.xlu0 %1260 }
 0x268   :  { %v1310_v32 = vsel %vm1123_vm8, %v2431_v26, 0.0  ;;  %v1277_v25 = vsub.f32 %v1245_v3, %v1261_v33 }
 0x269   :  { %2432 = vpow2.f32 %v1292_v31  ;;  %1311 = vadd.xlane.f32.xlu1 %v1310_v32 }
 0x26a   :  { %2434 = vpow2.f32 %v1282_v23  ;;  %v1288_v18 = vmul.f32 1.442695, %v1277_v25 }
 0x26c   :  { %2436 = vpow2.f32 %v1288_v18  ;;  %v1255_v60 = vpop.xlane.xlu1 %1254 }
 0x26d   :  { %v1275_v37 = vsub.f32 %v1243_v5, %v1255_v60 }
 0x26f   :  { %v2433_v0 = vpop.eup %2432  ;;  %v1284_v39 = vmul.f32 1.442695, %v1275_v37 }
 0x270   :  { %v1313_v2 = vsel %vm1123_vm8, %v2433_v0, 0.0  ;;  %v2435_v34 = vpop.eup %2434 }
 0x271   :  { %1314 = vadd.xlane.f32.xlu2 %v1313_v2  ;;  %v1298_v35 = vsel %vm1123_vm8, %v2435_v34, 0.0 }
 0x272   :  { %v2981_v21 = vpop.eup %2436 }
 0x273   :  { %v1307_v38 = vsel %vm1123_vm8, %v2981_v21, 0.0 }
 0x279   :  { %1299 = vadd.xlane.f32.xlu2 %v1298_v35 }
 0x27c   :  { %v1270_v8 = vpop.xlane.xlu2 %1269 }
 0x27d   :  { %v1280_v36 = vsub.f32 %v1248_v12, %v1270_v8 }
 0x27f   :  { %v1294_v61 = vmul.f32 1.442695, %v1280_v36 }
 0x281   :  { %2438 = vpow2.f32 %v1294_v61  ;;  %1308 = vadd.xlane.f32.xlu2 %v1307_v38  ;;  %v2397_v61 = vld [vmem:[%s3099_s9] sm:$0xff] }
 0x282   :  { %2440 = vpow2.f32 %v1284_v39  ;;  %1503 = vmatpush.bf16.msrb.mxu0 %v2397_v61 }
 0x284   :  { %v1273_v40 = vpop.xlane.xlu2 %1272 }
 0x285   :  { %v1281_v41 = vsub.f32 %v1249_v16, %v1273_v40 }
 0x287   :  { %v2439_v42 = vpop.eup %2438  ;;  %v1296_v43 = vmul.f32 1.442695, %v1281_v41 }
 0x288   :  { %v1316_v44 = vsel %vm1123_vm8, %v2439_v42, 0.0  ;;  %v2441_v46 = vpop.eup %2440 }
 0x289   :  { %2442 = vpow2.f32 %v1296_v43  ;;  %1317 = vadd.xlane.f32.xlu0 %v1316_v44  ;;  %v1301_v52 = vsel %vm1123_vm8, %v2441_v46, 0.0  ;;  %v2400_v43 = vld [vmem:[%s3099_s9 + $0x18] sm:$0xff] }
 0x28a   :  { %1587 = vmatpush.bf16.msra.mxu3 %v2400_v43 }
 0x28c   :  { %v1258_v45 = vpop.xlane.xlu2 %1257 }
 0x28d   :  { %v1276_v47 = vsub.f32 %v1244_v22, %v1258_v45  ;;  %v2398_v45 = vld [vmem:[%s3099_s9 + $0x8] sm:$0xff] }
 0x28e   :  { %1531 = vmatpush.bf16.msrb.mxu1 %v2398_v45 }
 0x28f   :  { %v2443_v48 = vpop.eup %2442  ;;  %v1286_v49 = vmul.f32 1.442695, %v1276_v47 }
 0x290   :  { %v1319_v50 = vsel %vm1123_vm8, %v2443_v48, 0.0 }
 0x291   :  { %2444 = vpow2.f32 %v1286_v49  ;;  %1320 = vadd.xlane.f32.xlu1 %v1319_v50  ;;  %1302 = vadd.xlane.f32.xlu0 %v1301_v52 }
 0x297   :  { %v2445_v53 = vpop.eup %2444 }
 0x298   :  { %v1304_v54 = vsel %vm1123_vm8, %v2445_v53, 0.0 }
 0x299   :  { %1305 = vadd.xlane.f32.xlu1 %v1304_v54 }
 0x2dc   :  { %v1312_v55 = vpop.xlane.xlu1 %1311 }
 0x2dd   :  { %2446 = vrcp.f32 %v1312_v55 }
 0x2e3   :  { %v2447_v57 = vpop.eup %2446 }
 0x2e4   :  { %v1315_v56 = vpop.xlane.xlu2 %1314  ;;  %v1334_v58 = vmul.f32 %v2447_v57, %v2431_v26 }
 0x2e5   :  { %2448 = vrcp.f32 %v1315_v56 }
 0x2e6   :  { %v1342_v62 = vpack.c.bf16 %v1334_v58, %v1334_v58 }
 0x2e8   :  { %v1412_v3 = vunpack.c.l.b16 %v1342_v62 }
 0x2eb   :  { %v2449_v59 = vpop.eup %2448 }
 0x2ec   :  { %v1335_v63 = vmul.f32 %v2449_v59, %v2433_v0  ;;  %v1300_v9 = vpop.xlane.xlu2 %1299 }
 0x2ed   :  { %2450 = vrcp.f32 %v1300_v9 }
 0x2ee   :  { %v1343_v1 = vpack.c.bf16 %v1335_v63, %v1335_v63 }
 0x2f0   :  { %v1413_v4 = vunpack.c.l.b16 %v1343_v1 }
 0x2f2   :  { %v1414_v5 = vpack.c.b16 %v1413_v4, %v1412_v3 }
 0x2f3   :  { %v2451_v14 = vpop.eup %2450 }
 0x2f4   :  { %2227 = vmatmul.msk.bf16.vlgmr.msrb.gmra.mxu2 %vm1123_vm8, %v1414_v5  ;;  %v1309_v11 = vpop.xlane.xlu2 %1308  ;;  %v1330_v16 = vmul.f32 %v2451_v14, %v2435_v34 }
 0x2f6   :  { %v1338_v51 = vpack.c.bf16 %v1330_v16, %v1330_v16 }
 0x2f8   :  { %v1356_v30 = vunpack.c.l.b16 %v1338_v51 }
 0x2fc   :  { %v1318_v10 = vpop.xlane.xlu0 %1317 }
 0x2fd   :  { %2452 = vrcp.f32 %v1318_v10 }
 0x303   :  { %v2453_v15 = vpop.eup %2452 }
 0x304   :  { %v1303_v12 = vpop.xlane.xlu0 %1302  ;;  %v1321_v13 = vpop.xlane.xlu1 %1320  ;;  %v1336_v17 = vmul.f32 %v2453_v15, %v2439_v42 }
 0x305   :  { %2454 = vrcp.f32 %v1303_v12 }
 0x306   :  { %2456 = vrcp.f32 %v1321_v13  ;;  %v1344_v27 = vpack.c.bf16 %v1336_v17, %v1336_v17 }
 0x307   :  { %2458 = vrcp.f32 %v1309_v11 }
 0x308   :  { %v1440_v23 = vunpack.c.l.b16 %v1344_v27 }
 0x30b   :  { %v2455_v19 = vpop.eup %2454 }
 0x30c   :  { %v2457_v22 = vpop.eup %2456  ;;  %v1331_v6 = vmul.f32 %v2455_v19, %v2441_v46  ;;  %v1306_v24 = vpop.xlane.xlu1 %1305 }
 0x30d   :  { %v2459_v7 = vpop.eup %2458  ;;  %v1337_v28 = vmul.f32 %v2457_v22, %v2443_v48  ;;  %2460 = vrcp.f32 %v1306_v24  ;;  %v2474_v22 = vld [vmem:[%s3090_s0] sm:$0xff] }
 0x30e   :  { %v1339_v29 = vpack.c.bf16 %v1331_v6, %v1331_v6  ;;  %v1333_v31 = vmul.f32 %v2459_v7, %v2981_v21  ;;  %v2399_v21 = vld [vmem:[%s3099_s9 + $0x10] sm:$0xff] }
 0x30f   :  { %v1345_v26 = vpack.c.bf16 %v1337_v28, %v1337_v28  ;;  %1559 = vmatpush.bf16.msra.mxu2 %v2399_v21 }
 0x310   :  { %v1357_v32 = vunpack.c.l.b16 %v1339_v29  ;;  %v1341_v18 = vpack.c.bf16 %v1333_v31, %v1333_v31  ;;  %v2475_v31 = vld [vmem:[%s3090_s0 + $0x8] sm:$0xff] }
 0x311   :  { %v1441_v33 = vunpack.c.l.b16 %v1345_v26 }
 0x312   :  { %v1358_v0 = vpack.c.b16 %v1357_v32, %v1356_v30  ;;  %v1385_v60 = vunpack.c.l.b16 %v1341_v18  ;;  %v2407_v18 = vld [vmem:[%s3102_s12 + $0x10] sm:$0xff] }
 0x313   :  { %v2461_v25 = vpop.eup %2460  ;;  %v1442_v2 = vpack.c.b16 %v1441_v33, %v1440_v23 }
 0x314   :  { %v1332_v34 = vmul.f32 %v2461_v25, %v2445_v53  ;;  %2225 = vmatmul.msk.bf16.vlgmr.msra.gmra.mxu0 %vm1123_vm8, %v1358_v0  ;;  %v2404_v0 = vld [vmem:[%s3101_s11 + $0x18] sm:$0xff] }
 0x315   :  { %2228 = vmatmul.msk.bf16.vlgmr.msrb.gmra.mxu3 %vm1123_vm8, %v1442_v2  ;;  %v2408_v25 = vld [vmem:[%s3102_s12 + $0x18] sm:$0xff]  ;;  %1682 = vmatpush.bf16.msra.mxu0 %v2404_v0  ;;  %v2403_v2 = vld [vmem:[%s3101_s11 + $0x10] sm:$0xff] }
 0x316   :  { %v1340_v35 = vpack.c.bf16 %v1332_v34, %v1332_v34  ;;  %v2402_v34 = vld [vmem:[%s3101_s11 + $0x8] sm:$0xff] }
 0x318   :  { %v1384_v8 = vunpack.c.l.b16 %v1340_v35  ;;  %v2406_v35 = vld [vmem:[%s3102_s12 + $0x8] sm:$0xff] }
 0x319   :  { %1683 = vmatpush.bf16.msra.mxu0 %v2403_v2 }
 0x31a   :  { %v1386_v36 = vpack.c.b16 %v1385_v60, %v1384_v8  ;;  %v2401_v8 = vld [vmem:[%s3101_s11] sm:$0xff] }
 0x31c   :  { %2226 = vmatmul.msk.bf16.vlgmr.msra.gmra.mxu1 %vm1123_vm8, %v1386_v36  ;;  %v2405_v36 = vld [vmem:[%s3102_s12] sm:$0xff] }
 0x31d   :  { %1728 = vmatpush.bf16.msra.mxu1 %v2408_v25  ;;  %1684 = vmatpush.bf16.msra.mxu0 %v2402_v34 }
 0x321   :  { %1729 = vmatpush.bf16.msra.mxu1 %v2407_v18  ;;  %1685 = vmatpush.bf16.msra.mxu0 %v2401_v8 }
 0x325   :  { %1730 = vmatpush.bf16.msra.mxu1 %v2406_v35 }
 0x329   :  { %1731 = vmatpush.bf16.msra.mxu1 %v2405_v36 }
 0x377   :  { %v1433_v37 = vpop.f32.mrf.mxu2 }
 0x378   :  { %v1470_v38 = vpack.c.bf16 %v1433_v37, %v1433_v37 }
 0x37a   :  { %v1540_v41 = vunpack.c.l.b16 %v1470_v38 }
 0x37f   :  { %v1435_v39 = vpop.f32.mrf.mxu2 }
 0x380   :  { %v1471_v40 = vpack.c.bf16 %v1435_v39, %v1435_v39 }
 0x382   :  { %v1541_v42 = vunpack.c.l.b16 %v1471_v40 }
 0x384   :  { %v1542_v44 = vpack.c.b16 %v1541_v42, %v1540_v41 }
 0x386   :  { %2243 = vmatmul.msk.bf16.vlgmr.msra.gmra.mxu2 %vm1123_vm8, %v1542_v44 }
 0x391   :  { %v1377_v46 = vpop.f32.mrf.mxu0 }
 0x392   :  { %v1466_v47 = vpack.c.bf16 %v1377_v46, %v1377_v46 }
 0x394   :  { %v1484_v53 = vunpack.c.l.b16 %v1466_v47 }
 0x398   :  { %v1461_v48 = vpop.f32.mrf.mxu3 }
 0x399   :  { %v1379_v49 = vpop.f32.mrf.mxu0  ;;  %v1405_v50 = vpop.f32.mrf.mxu1  ;;  %v1472_v56 = vpack.c.bf16 %v1461_v48, %v1461_v48 }
 0x39a   :  { %v1467_v52 = vpack.c.bf16 %v1379_v49, %v1379_v49  ;;  %v1468_v57 = vpack.c.bf16 %v1405_v50, %v1405_v50 }
 0x39b   :  { %v1568_v1 = vunpack.c.l.b16 %v1472_v56 }
 0x39c   :  { %v1485_v54 = vunpack.c.l.b16 %v1467_v52  ;;  %v1512_v4 = vunpack.c.l.b16 %v1468_v57 }
 0x39e   :  { %v1486_v55 = vpack.c.b16 %v1485_v54, %v1484_v53 }
 0x3a0   :  { %v1463_v58 = vpop.f32.mrf.mxu3  ;;  %2233 = vmatmul.msk.bf16.vlgmr.msrb.gmra.mxu0 %vm1123_vm8, %v1486_v55 }
 0x3a1   :  { %v1473_v59 = vpack.c.bf16 %v1463_v58, %v1463_v58  ;;  %v1407_v62 = vpop.f32.mrf.mxu1 }
 0x3a2   :  { %v1469_v63 = vpack.c.bf16 %v1407_v62, %v1407_v62  ;;  %v2416_v62 = vld [vmem:[%s3103_s13 + $0x38] sm:$0xff] }
 0x3a3   :  { %v1569_v3 = vunpack.c.l.b16 %v1473_v59  ;;  %1845 = vmatpush.bf16.msrb.mxu2 %v2416_v62 }
 0x3a4   :  { %v1513_v5 = vunpack.c.l.b16 %v1469_v63  ;;  %v2415_v63 = vld [vmem:[%s3103_s13 + $0x30] sm:$0xff] }
 0x3a5   :  { %v1570_v9 = vpack.c.b16 %v1569_v3, %v1568_v1  ;;  %v2414_v1 = vld [vmem:[%s3103_s13 + $0x28] sm:$0xff]  ;;  %v2413_v3 = vld [vmem:[%s3103_s13 + $0x20] sm:$0xff] }
 0x3a6   :  { %v1514_v10 = vpack.c.b16 %v1513_v5, %v1512_v4  ;;  %v2412_v4 = vld [vmem:[%s3103_s13 + $0x18] sm:$0xff]  ;;  %v2411_v5 = vld [vmem:[%s3103_s13 + $0x10] sm:$0xff] }
 0x3a7   :  { %2248 = vmatmul.msk.bf16.vlgmr.msra.gmra.mxu3 %vm1123_vm8, %v1570_v9  ;;  %1846 = vmatpush.bf16.msrb.mxu2 %v2415_v63 }
 0x3a8   :  { %2238 = vmatmul.msk.bf16.vlgmr.msrb.gmra.mxu1 %vm1123_vm8, %v1514_v10 }
 0x3ab   :  { %1847 = vmatpush.bf16.msrb.mxu2 %v2414_v1 }
 0x3af   :  { %1848 = vmatpush.bf16.msrb.mxu2 %v2413_v3 }
 0x3b3   :  { %1849 = vmatpush.bf16.msrb.mxu2 %v2412_v4 }
 0x3b7   :  { %1850 = vmatpush.bf16.msrb.mxu2 %v2411_v5 }
 0x409   :  { %v1561_v12 = vpop.f32.mrf.mxu2 }
 0x411   :  { %v1563_v7 = vpop.f32.mrf.mxu2 }
 0x41d   :  { %v1505_v11 = vpop.f32.mrf.mxu0 }
 0x425   :  { %v1533_v13 = vpop.f32.mrf.mxu1  ;;  %v1507_v19 = vpop.f32.mrf.mxu0 }
 0x426   :  { %v1594_v14 = vadd.f32 %v1533_v13, %v1505_v11  ;;  %v2410_v11 = vld [vmem:[%s3103_s13 + $0x8] sm:$0xff] }
 0x427   :  { %1851 = vmatpush.bf16.msrb.mxu2 %v2410_v11 }
 0x428   :  { %v1596_v15 = vadd.f32 %v1594_v14, %v1561_v12  ;;  %v2409_v12 = vld [vmem:[%s3103_s13] sm:$0xff]  ;;  %s2504_s13 = smov [#allocation2]  }
 0x429   :  { %s1867_s0 = sshll.u32 %s2504_s13, 4  ;;  %s1868_s0 = int_to_ptr.vmem [resolvable:$true] %s1867_s0 }
 0x42a   :  { %v1589_v16 = vpop.f32.mrf.mxu3 }
 0x42b   :  { %v1598_v17 = vadd.f32 %v1596_v15, %v1589_v16  ;;  %1852 = vmatpush.bf16.msrb.mxu2 %v2409_v12 }
 0x42d   :  { %v3013_v51 = vadd.f32 %v2474_v22, %v1598_v17  ;;  %v1535_v6 = vpop.f32.mrf.mxu1 }
 0x42e   :  { %v1595_v24 = vadd.f32 %v1535_v6, %v1507_v19 }
 0x42f   :  { %v1603_v27 = vmul.f32 %v3013_v51, %v3013_v51 }
 0x430   :  { %v1597_v28 = vadd.f32 %v1595_v24, %v1563_v7 }
 0x431   :  { %v1605_v29 = vsel %vm58_vm0, %v1603_v27, 0.0 }
 0x432   :  { %v1591_v26 = vpop.f32.mrf.mxu3  ;;  %1606 = vadd.xlane.f32.xlu0 %v1605_v29 }
 0x433   :  { %v1599_v30 = vadd.f32 %v1597_v28, %v1591_v26 }
 0x435   :  { %v3021_v32 = vadd.f32 %v2475_v31, %v1599_v30 }
 0x437   :  { %v1604_v23 = vmul.f32 %v3021_v32, %v3021_v32 }
 0x439   :  { %v1608_v33 = vsel %vm58_vm0, %v1604_v23, 0.0 }
 0x43a   :  { %1609 = vadd.xlane.f32.xlu1 %v1608_v33 }
 0x4a5   :  { %v1607_v60 = vpop.xlane.xlu0 %1606 }
 0x4a6   :  { %v1611_v21 = vmul.f32 %v1607_v60, %v2622_v20 }
 0x4a8   :  { %v1613_v37 = vadd.f32 1e-06, %v1611_v21 }
 0x4aa   :  { %2462 = vrsqrt.f32 %v1613_v37  ;;  %vm1621_vm1 = vweird.f32 %v1613_v37 }
 0x4ad   :  { %v1610_v61 = vpop.xlane.xlu1 %1609 }
 0x4ae   :  { %v1612_v38 = vmul.f32 %v1610_v61, %v2622_v20  ;;  %v2423_v20 = vld [vmem:[%s3100_s10] ss:$0 sm:$0xff] }
 0x4b0   :  { %v2463_v39 = vpop.eup %2462  ;;  %v1614_v40 = vadd.f32 1e-06, %v1612_v38 }
 0x4b1   :  { %v1616_v41 = vmul.f32 %v2463_v39, %v1613_v37  ;;  %vm1622_vm15 = vweird.f32 %v2463_v39 }
 0x4b2   :  { %2464 = vrsqrt.f32 %v1614_v40  ;;  %vm1623_vm2 = vmor %vm1621_vm1, %vm1622_vm15  ;;  %vm1631_vm4 = vweird.f32 %v1614_v40 }
 0x4b3   :  { %v1617_v42 = vmul.f32 %v2463_v39, %v1616_v41 }
 0x4b5   :  { %v1618_v43 = vmul.f32 0.5, %v1617_v42 }
 0x4b7   :  { %v1619_v44 = vsub.f32 1.5, %v1618_v43 }
 0x4b8   :  { %v2465_v45 = vpop.eup %2464 }
 0x4b9   :  { %v1626_v46 = vmul.f32 %v2465_v45, %v1614_v40  ;;  %v1620_v47 = vmul.f32 %v2463_v39, %v1619_v44  ;;  %vm1632_vm3 = vweird.f32 %v2465_v45 }
 0x4ba   :  { %vm1633_vm5 = vmor %vm1631_vm4, %vm1632_vm3 }
 0x4bb   :  { %v1627_v48 = vmul.f32 %v2465_v45, %v1626_v46  ;;  %v1624_v50 = vsel %vm1623_vm2, %v2463_v39, %v1620_v47 }
 0x4bc   :  { %v1635_v54 = vmul.f32 %v1624_v50, %v3013_v51 }
 0x4bd   :  { %v1628_v49 = vmul.f32 0.5, %v1627_v48 }
 0x4be   :  { %v1640_v57 = vmul.f32 %v2423_v20, %v1635_v54 }
 0x4bf   :  { %v1629_v52 = vsub.f32 1.5, %v1628_v49 }
 0x4c1   :  { %v1630_v53 = vmul.f32 %v2465_v45, %v1629_v52 }
 0x4c3   :  { %v1634_v55 = vsel %vm1633_vm5, %v2465_v45, %v1630_v53 }
 0x4c4   :  { %v1636_v56 = vmul.f32 %v1634_v55, %v3021_v32 }
 0x4c6   :  { %v1641_v58 = vmul.f32 %v2423_v20, %v1636_v56 }
 0x4c8   :  { %v1642_v59 = vpack.c.bf16 %v1641_v58, %v1640_v57 }
 0x4ca   :  { %2265 = vmatmul.msk.bf16.vlgmr.msra.gmra.mxu0 %vm58_vm0, %v1642_v59  ;;  %2282 = vmatmul.msk.bf16.vlgmr.msra.gmra.mxu1 %vm58_vm0, %v1642_v59 }
 0x547   :  { %v1687_v9 = vpop.f32.mrf.mxu0  ;;  %v1733_v31 = vpop.f32.mrf.mxu1 }
 0x548   :  { %v2283_v10 = vmul.f32 -1.442695, %v1687_v9 }
 0x54a   :  { %2466 = vpow2.f32 %v2283_v10 }
 0x54f   :  { %v1689_v13 = vpop.f32.mrf.mxu0  ;;  %v1735_v61 = vpop.f32.mrf.mxu1 }
 0x550   :  { %v2467_v14 = vpop.eup %2466  ;;  %v2284_v15 = vmul.f32 -1.442695, %v1689_v13 }
 0x551   :  { %v1744_v16 = vadd.f32 1.0, %v2467_v14 }
 0x552   :  { %2468 = vpow2.f32 %v2284_v15 }
 0x553   :  { %2470 = vrcp.f32 %v1744_v16  ;;  %v1757_v29 = vand.u32 2147483648, %v1744_v16  ;;  %vm1751_vm7 = vweird.f32 %v1744_v16  ;;  %v1755_v26 = vand.u32 2147483647, %v1744_v16 }
 0x555   :  { %v1758_v0 = vor.u32 1.1754944e-38, %v1757_v29  ;;  %vm1756_vm9 = vcmp.eq.f32.partialorder %v1755_v26, 8.507059e+37 }
 0x558   :  { %v2469_v17 = vpop.eup %2468 }
 0x559   :  { %v2471_v19 = vpop.eup %2470  ;;  %v1745_v22 = vadd.f32 1.0, %v2469_v17 }
 0x55a   :  { %v1747_v6 = vmul.f32 %v2471_v19, %v1744_v16  ;;  %vm1752_vm6 = vweird.f32 %v2471_v19 }
 0x55b   :  { %2472 = vrcp.f32 %v1745_v22  ;;  %vm1753_vm8 = vmor %vm1751_vm7, %vm1752_vm6  ;;  %v1772_v25 = vand.u32 2147483648, %v1745_v22  ;;  %v1770_v18 = vand.u32 2147483647, %v1745_v22  ;;  %vm1766_vm11 = vweird.f32 %v1745_v22 }
 0x55c   :  { %v1748_v24 = vsub.f32 1.0, %v1747_v6 }
 0x55d   :  { %v1773_v60 = vor.u32 1.1754944e-38, %v1772_v25  ;;  %vm1771_vm13 = vcmp.eq.f32.partialorder %v1770_v18, 8.507059e+37 }
 0x55e   :  { %v1749_v7 = vmul.f32 %v2471_v19, %v1748_v24 }
 0x560   :  { %v1750_v27 = vadd.f32 %v2471_v19, %v1749_v7 }
 0x561   :  { %v2473_v28 = vpop.eup %2472 }
 0x562   :  { %v1762_v30 = vmul.f32 %v2473_v28, %v1745_v22  ;;  %v1754_v23 = vsel %vm1753_vm8, %v2471_v19, %v1750_v27  ;;  %vm1767_vm10 = vweird.f32 %v2473_v28 }
 0x563   :  { %v1759_v34 = vsel %vm1756_vm9, %v1758_v0, %v1754_v23  ;;  %vm1768_vm12 = vmor %vm1766_vm11, %vm1767_vm10 }
 0x564   :  { %v1763_v33 = vsub.f32 1.0, %v1762_v30  ;;  %v1776_v8 = vmul.f32 %v1759_v34, %v1687_v9 }
 0x566   :  { %v1764_v2 = vmul.f32 %v2473_v28, %v1763_v33  ;;  %v1778_v38 = vmul.f32 %v1776_v8, %v1733_v31 }
 0x568   :  { %v1765_v35 = vadd.f32 %v2473_v28, %v1764_v2 }
 0x56a   :  { %v1769_v36 = vsel %vm1768_vm12, %v2473_v28, %v1765_v35 }
 0x56b   :  { %v1774_v21 = vsel %vm1771_vm13, %v1773_v60, %v1769_v36 }
 0x56c   :  { %v1777_v37 = vmul.f32 %v1774_v21, %v1689_v13 }
 0x56e   :  { %v1779_v39 = vmul.f32 %v1777_v37, %v1735_v61 }
 0x570   :  { %v1780_v40 = vpack.c.bf16 %v1779_v39, %v1778_v38 }
 0x572   :  { %1853 = vmatmul.bf16.vlgmr.msrb.gmra.mxu2 %v1780_v40 }
 0x5f5   :  { %v1854_v41 = vpop.f32.mrf.mxu2 }
 0x5f6   :  { %v1859_v42 = vadd.f32 %v1854_v41, %v3013_v51 }
 0x5f8   :  { %1861 = vst.msk [vmem:[#allocation2] sm:$0xff] %vm58_vm0, %v1859_v42 }
 0x5fd   :  { %v1856_v43 = vpop.f32.mrf.mxu2 }
 0x5fe   :  { %v1860_v44 = vadd.f32 %v1856_v43, %v3021_v32 }
 0x600   :  { %1862 = vst.msk [vmem:[#allocation2 + $0x8] sm:$0xff] %vm58_vm0, %v1860_v44 }
 0x601   :  { %1875 = dma.vmem_to_hbm [thread:$0]  %s1868_s0, 256, %s1870_s18, [#allocation3], %s2505_s3, %s2505_s3, %s2506_s19  }
 0x602   :  { %2500 = dma.done.wait [#allocation3], 256  }
 0x603   :  { %2501 = vsyncadd [#allocation3], 4294967040 }
 0x604   :  { %1880 = vsyncpa [#allocation3], 1 }

</bundles_post_ra>
